<compile_context>
chip_gen: v5e
topology: v5e:2x2
jax: 0.10.0
libtpu: 0.0.40
codegen_flags: <defaults>
</compile_context>

<pallas_src>
import math
import jax
import jax.numpy as jnp
from jax.experimental import pallas as pl
from jax.experimental.pallas import tpu as pltpu

# ---------------- model config (small, consistent with the module) ----------------
B = 2           # batch
S = 8           # seq_len
D = 32          # input_dim == embed_dim
H = 4           # num_heads
HD = D // H     # head_dim
F = 64          # dim_feedforward
EPS = 1e-5      # nn.LayerNorm default eps
N = B * S       # flattened token count


# ---------------- Pallas kernel: full EncoderBlock forward ----------------
def encoder_block_kernel(
    x_ref,        # (B, S, D)
    wq_ref,       # (H, D, HD)   per-head query projection
    wk_ref,       # (H, D, HD)
    wv_ref,       # (H, D, HD)
    bq_ref,       # (H, 1, HD)
    bk_ref,       # (H, 1, HD)
    bv_ref,       # (H, 1, HD)
    wo_ref,       # (H, HD, D)   o_proj split along its input (head) rows
    bo_ref,       # (1, D)
    g1_ref,       # (1, D)  norm1 gamma
    be1_ref,      # (1, D)  norm1 beta
    w1_ref,       # (D, F)
    bf1_ref,      # (1, F)
    w2_ref,       # (F, D)
    bf2_ref,      # (1, D)
    g2_ref,       # (1, D)  norm2 gamma
    be2_ref,      # (1, D)  norm2 beta
    o_ref,        # (B*S, D) output (reshaped to (B, S, D) in the wrapper)
):
    # Flatten once: all projections below are single 2-D (B*S, K) x (K, N) MXU dots.
    x2 = x_ref[...].reshape(N, D)                       # (16, 32)
    scale = 1.0 / math.sqrt(HD)

    # ---- Multi-head self-attention ----
    # Static unrolled loop over H=4 heads.  No lane-interior slicing of activations and no
    # head concat: head outputs are folded directly into the o_proj accumulation.
    attn_acc = jnp.zeros((N, D), jnp.float32)
    for h in range(H):
        q = (jnp.dot(x2, wq_ref[h], preferred_element_type=jnp.float32)
             + bq_ref[h]).reshape(B, S, HD)
        k = (jnp.dot(x2, wk_ref[h], preferred_element_type=jnp.float32)
             + bk_ref[h]).reshape(B, S, HD)
        v = (jnp.dot(x2, wv_ref[h], preferred_element_type=jnp.float32)
             + bv_ref[h]).reshape(B, S, HD)

        logits = jnp.einsum("bqd,bkd->bqk", q, k,
                            preferred_element_type=jnp.float32) * scale   # (B, S, S)
        m = jnp.max(logits, axis=-1, keepdims=True)
        p = jnp.exp(logits - m)
        # Divide -> approximate reciprocal on the otherwise-idle EUP slot.
        attn = p * pl.reciprocal(jnp.sum(p, axis=-1, keepdims=True), approx=True)

        vals = jnp.einsum("bqk,bkd->bqd", attn, v,
                          preferred_element_type=jnp.float32).reshape(N, HD)
        attn_acc = attn_acc + jnp.dot(vals, wo_ref[h],
                                      preferred_element_type=jnp.float32)
    attn_out = attn_acc + bo_ref[...]                   # (16, 32)

    # ---- residual + LayerNorm 1 (f32 elementwise) ----
    x1 = x2 + attn_out
    mu1 = jnp.mean(x1, axis=-1, keepdims=True)
    var1 = jnp.mean((x1 - mu1) ** 2, axis=-1, keepdims=True)
    x1n = (x1 - mu1) * jax.lax.rsqrt(var1 + EPS)
    x1n = x1n * g1_ref[...] + be1_ref[...]

    # ---- feed-forward (Linear -> ReLU -> Linear), 2-D dots ----
    hdn = jnp.dot(x1n, w1_ref[...], preferred_element_type=jnp.float32) + bf1_ref[...]
    hdn = jnp.maximum(hdn, 0.0)
    ffn = jnp.dot(hdn, w2_ref[...], preferred_element_type=jnp.float32) + bf2_ref[...]

    # ---- residual + LayerNorm 2 ----
    y = x1n + ffn
    mu2 = jnp.mean(y, axis=-1, keepdims=True)
    var2 = jnp.mean((y - mu2) ** 2, axis=-1, keepdims=True)
    yn = (y - mu2) * jax.lax.rsqrt(var2 + EPS)
    o_ref[...] = yn * g2_ref[...] + be2_ref[...]


# ---------------- host-side weight re-layout (outside the kernel) ----------------
def prepare_kernel_params(p):
    """Split/permute the canonical (PyTorch-layout) parameters into per-head blocks.

    The canonical qkv weight follows this module's semantics: head h owns columns
    [h*3*HD, (h+1)*3*HD) of the (D, 3D) matrix, laid out as [q | k | v] (that is what
    reshape(B,S,H,3*HD) + chunk(3) in MultiheadAttention.forward implies).  NOTE: this is
    NOT the [Q|K|V]-stacked layout of nn.MultiheadAttention; loading such a checkpoint only
    requires changing the permutation here — the kernel is layout-agnostic.
    """
    wqkv = p["wqkv"].reshape(D, H, 3, HD)
    bqkv = p["bqkv"].reshape(H, 3, HD)
    return {
        "wq": jnp.transpose(wqkv[:, :, 0, :], (1, 0, 2)),   # (H, D, HD)
        "wk": jnp.transpose(wqkv[:, :, 1, :], (1, 0, 2)),
        "wv": jnp.transpose(wqkv[:, :, 2, :], (1, 0, 2)),
        "bq": bqkv[:, 0, :].reshape(H, 1, HD),
        "bk": bqkv[:, 1, :].reshape(H, 1, HD),
        "bv": bqkv[:, 2, :].reshape(H, 1, HD),
        "wo": p["wo"].reshape(H, HD, D),                    # head h -> rows [h*HD, (h+1)*HD)
        "bo": p["bo"],
        "g1": p["g1"], "be1": p["be1"],
        "w1": p["w1"], "bf1": p["bf1"],
        "w2": p["w2"], "bf2": p["bf2"],
        "g2": p["g2"], "be2": p["be2"],
    }


@jax.jit
def encoder_block(x, params):
    kp = prepare_kernel_params(params)
    vmem = pl.BlockSpec(memory_space=pltpu.MemorySpace.VMEM)
    args = (
        x,
        kp["wq"], kp["wk"], kp["wv"],
        kp["bq"], kp["bk"], kp["bv"],
        kp["wo"], kp["bo"],
        kp["g1"], kp["be1"],
        kp["w1"], kp["bf1"],
        kp["w2"], kp["bf2"],
        kp["g2"], kp["be2"],
    )
    out = pl.pallas_call(
        encoder_block_kernel,
        out_shape=jax.ShapeDtypeStruct((N, D), jnp.float32),
        in_specs=[vmem] * len(args),
        out_specs=vmem,
    )(*args)
    # At B*S=16 a single gridless VMEM-resident call is optimal (fixed per-step overhead
    # dominates).  For production token counts: add a token-tiled grid (weights' index_map
    # returning (0, 0) so they stay resident), mark the token axis "parallel" for v7x's two
    # TensorCores, budget tiles for 64 MiB VMEM on v7x, and feed bf16 matmul operands on
    # v6e/v7x (keep f32 elementwise everywhere, mandatory on v5e).
    return out.reshape(B, S, D)


# ---------------- deterministic parameter init (xavier_uniform / zeros / ones) ----------------
def xavier_uniform(key, shape_in_out):
    fan_in, fan_out = shape_in_out
    bound = math.sqrt(6.0 / (fan_in + fan_out))
    # stored as (in, out) so x @ W applies the layer directly
    return jax.random.uniform(key, (fan_in, fan_out), jnp.float32, -bound, bound)


def make_params(key):
    ks = jax.random.split(key, 4)
    return {
        # attention (canonical layout, see prepare_kernel_params)
        "wqkv": xavier_uniform(ks[0], (D, 3 * D)),
        "bqkv": jnp.zeros((1, 3 * D), jnp.float32),
        "wo":   xavier_uniform(ks[1], (D, D)),
        "bo":   jnp.zeros((1, D), jnp.float32),
        # layer norms (default init: gamma=1, beta=0)
        "g1":   jnp.ones((1, D), jnp.float32),
        "be1":  jnp.zeros((1, D), jnp.float32),
        "g2":   jnp.ones((1, D), jnp.float32),
        "be2":  jnp.zeros((1, D), jnp.float32),
        # MLP
        "w1":   xavier_uniform(ks[2], (D, F)),
        "bf1":  jnp.zeros((1, F), jnp.float32),
        "w2":   xavier_uniform(ks[3], (F, D)),
        "bf2":  jnp.zeros((1, D), jnp.float32),
    }


# ---------------- pure-JAX reference (PyTorch-module semantics) for a sanity check ----------------
def encoder_block_ref(x, p):
    qkv = x @ p["wqkv"] + p["bqkv"][0]
    qkv = qkv.reshape(B, S, H, 3 * HD).transpose(0, 2, 1, 3)
    q, k, v = jnp.split(qkv, 3, axis=-1)
    logits = jnp.einsum("bhqd,bhkd->bhqk", q, k) / math.sqrt(HD)
    attn = jax.nn.softmax(logits, axis=-1)
    vals = jnp.einsum("bhqk,bhkd->bhqd", attn, v).transpose(0, 2, 1, 3).reshape(B, S, D)
    attn_out = vals @ p["wo"] + p["bo"][0]

    x1 = x + attn_out
    mu = x1.mean(-1, keepdims=True)
    var = ((x1 - mu) ** 2).mean(-1, keepdims=True)
    x1n = (x1 - mu) / jnp.sqrt(var + EPS) * p["g1"][0] + p["be1"][0]

    hdn = jnp.maximum(x1n @ p["w1"] + p["bf1"][0], 0.0)
    ffn = hdn @ p["w2"] + p["bf2"][0]

    x2 = x1n + ffn
    mu2 = x2.mean(-1, keepdims=True)
    var2 = ((x2 - mu2) ** 2).mean(-1, keepdims=True)
    return (x2 - mu2) / jnp.sqrt(var2 + EPS) * p["g2"][0] + p["be2"][0]


if __name__ == "__main__":
    key = jax.random.PRNGKey(0)
    kx, kparam = jax.random.split(key)
    x = jax.random.normal(kx, (B, S, D), jnp.float32)
    params = make_params(kparam)

    out = jax.block_until_ready(encoder_block(x, params))
    ref = encoder_block_ref(x, params)

    assert out.shape == (B, S, D)
    # tolerance accounts for the approximate (EUP) reciprocal in the softmax denominator
    assert jnp.allclose(out, ref, atol=2e-3, rtol=2e-3), "Pallas output mismatch vs reference"

    print("KERNEL_OK")
</pallas_src>

<mosaic_0001>
module attributes {stable_mosaic.version = 11 : i64} {
  func.func @encoder_block_kernel(%arg0: memref<2x8x32xf32, #tpu.memory_space<vmem>>, %arg1: memref<4x32x8xf32, #tpu.memory_space<vmem>>, %arg2: memref<4x32x8xf32, #tpu.memory_space<vmem>>, %arg3: memref<4x32x8xf32, #tpu.memory_space<vmem>>, %arg4: memref<4x1x8xf32, #tpu.memory_space<vmem>>, %arg5: memref<4x1x8xf32, #tpu.memory_space<vmem>>, %arg6: memref<4x1x8xf32, #tpu.memory_space<vmem>>, %arg7: memref<4x8x32xf32, #tpu.memory_space<vmem>>, %arg8: memref<1x32xf32, #tpu.memory_space<vmem>>, %arg9: memref<1x32xf32, #tpu.memory_space<vmem>>, %arg10: memref<1x32xf32, #tpu.memory_space<vmem>>, %arg11: memref<32x64xf32, #tpu.memory_space<vmem>>, %arg12: memref<1x64xf32, #tpu.memory_space<vmem>>, %arg13: memref<64x32xf32, #tpu.memory_space<vmem>>, %arg14: memref<1x32xf32, #tpu.memory_space<vmem>>, %arg15: memref<1x32xf32, #tpu.memory_space<vmem>>, %arg16: memref<1x32xf32, #tpu.memory_space<vmem>>, %arg17: memref<16x32xf32, #tpu.memory_space<vmem>>) attributes {dimension_semantics = [], scalar_prefetch = 0 : i64, scratch_operands = 0 : i64, tpu.core_type = #tpu.core_type<tc>} {
    %c0 = arith.constant 0 : index
    %c0_0 = arith.constant 0 : index
    %c0_1 = arith.constant 0 : index
    %0 = vector.load %arg0[%c0, %c0_0, %c0_1] : memref<2x8x32xf32, #tpu.memory_space<vmem>>, vector<2x8x32xf32>
    %1 = vector.shape_cast %0 : vector<2x8x32xf32> to vector<16x32xf32>
    %cst = arith.constant 0.000000e+00 : f32
    %2 = vector.broadcast %cst : f32 to vector<16x32xf32>
    %c0_2 = arith.constant 0 : index
    %c0_3 = arith.constant 0 : index
    %c0_4 = arith.constant 0 : index
    %3 = vector.load %arg1[%c0_2, %c0_3, %c0_4] : memref<4x32x8xf32, #tpu.memory_space<vmem>>, vector<1x32x8xf32>
    %4 = vector.shape_cast %3 : vector<1x32x8xf32> to vector<32x8xf32>
    %cst_5 = arith.constant dense<0.000000e+00> : vector<16x8xf32>
    %5 = tpu.matmul %1, %4, %cst_5 {dimension_numbers = #tpu.dot_dimension_numbers<[1], [0], [0], [1], [0, 0, 1, 1], [], []>} : vector<16x32xf32>, vector<32x8xf32>, vector<16x8xf32> -> vector<16x8xf32>
    %c0_6 = arith.constant 0 : index
    %c0_7 = arith.constant 0 : index
    %c0_8 = arith.constant 0 : index
    %6 = vector.load %arg4[%c0_6, %c0_7, %c0_8] : memref<4x1x8xf32, #tpu.memory_space<vmem>>, vector<1x1x8xf32>
    %7 = vector.shape_cast %6 : vector<1x1x8xf32> to vector<1x8xf32>
    %8 = vector.broadcast %7 : vector<1x8xf32> to vector<16x8xf32>
    %9 = arith.addf %5, %8 : vector<16x8xf32>
    %10 = vector.shape_cast %9 : vector<16x8xf32> to vector<2x8x8xf32>
    %c0_9 = arith.constant 0 : index
    %c0_10 = arith.constant 0 : index
    %c0_11 = arith.constant 0 : index
    %11 = vector.load %arg2[%c0_9, %c0_10, %c0_11] : memref<4x32x8xf32, #tpu.memory_space<vmem>>, vector<1x32x8xf32>
    %12 = vector.shape_cast %11 : vector<1x32x8xf32> to vector<32x8xf32>
    %cst_12 = arith.constant dense<0.000000e+00> : vector<16x8xf32>
    %13 = tpu.matmul %1, %12, %cst_12 {dimension_numbers = #tpu.dot_dimension_numbers<[1], [0], [0], [1], [0, 0, 1, 1], [], []>} : vector<16x32xf32>, vector<32x8xf32>, vector<16x8xf32> -> vector<16x8xf32>
    %c0_13 = arith.constant 0 : index
    %c0_14 = arith.constant 0 : index
    %c0_15 = arith.constant 0 : index
    %14 = vector.load %arg5[%c0_13, %c0_14, %c0_15] : memref<4x1x8xf32, #tpu.memory_space<vmem>>, vector<1x1x8xf32>
    %15 = vector.shape_cast %14 : vector<1x1x8xf32> to vector<1x8xf32>
    %16 = vector.broadcast %15 : vector<1x8xf32> to vector<16x8xf32>
    %17 = arith.addf %13, %16 : vector<16x8xf32>
    %18 = vector.shape_cast %17 : vector<16x8xf32> to vector<2x8x8xf32>
    %c0_16 = arith.constant 0 : index
    %c0_17 = arith.constant 0 : index
    %c0_18 = arith.constant 0 : index
    %19 = vector.load %arg3[%c0_16, %c0_17, %c0_18] : memref<4x32x8xf32, #tpu.memory_space<vmem>>, vector<1x32x8xf32>
    %20 = vector.shape_cast %19 : vector<1x32x8xf32> to vector<32x8xf32>
    %cst_19 = arith.constant dense<0.000000e+00> : vector<16x8xf32>
    %21 = tpu.matmul %1, %20, %cst_19 {dimension_numbers = #tpu.dot_dimension_numbers<[1], [0], [0], [1], [0, 0, 1, 1], [], []>} : vector<16x32xf32>, vector<32x8xf32>, vector<16x8xf32> -> vector<16x8xf32>
    %c0_20 = arith.constant 0 : index
    %c0_21 = arith.constant 0 : index
    %c0_22 = arith.constant 0 : index
    %22 = vector.load %arg6[%c0_20, %c0_21, %c0_22] : memref<4x1x8xf32, #tpu.memory_space<vmem>>, vector<1x1x8xf32>
    %23 = vector.shape_cast %22 : vector<1x1x8xf32> to vector<1x8xf32>
    %24 = vector.broadcast %23 : vector<1x8xf32> to vector<16x8xf32>
    %25 = arith.addf %21, %24 : vector<16x8xf32>
    %26 = vector.shape_cast %25 : vector<16x8xf32> to vector<2x8x8xf32>
    "tpu.trace_start"() <{level = 10 : i32, message = "bqd,bkd->bqk"}> : () -> ()
    %cst_23 = arith.constant dense<0.000000e+00> : vector<2x8x8xf32>
    %27 = tpu.matmul %10, %18, %cst_23 {dimension_numbers = #tpu.dot_dimension_numbers<[2], [2], [1], [1], [0, 0, 0, 1, 1, 1], [0], [0]>} : vector<2x8x8xf32>, vector<2x8x8xf32>, vector<2x8x8xf32> -> vector<2x8x8xf32>
    "tpu.trace_stop"() : () -> ()
    %cst_24 = arith.constant 0.353553385 : f32
    %28 = vector.broadcast %cst_24 : f32 to vector<2x8x8xf32>
    %29 = arith.mulf %27, %28 : vector<2x8x8xf32>
    %cst_25 = arith.constant dense<0xFF800000> : vector<2x8xf32>
    %30 = vector.multi_reduction <maximumf>, %29, %cst_25 [2] : vector<2x8x8xf32> to vector<2x8xf32>
    %31 = vector.shape_cast %30 : vector<2x8xf32> to vector<2x8x1xf32>
    %32 = vector.broadcast %31 : vector<2x8x1xf32> to vector<2x8x8xf32>
    %33 = arith.subf %29, %32 : vector<2x8x8xf32>
    %34 = math.exp %33 : vector<2x8x8xf32>
    %cst_26 = arith.constant dense<0.000000e+00> : vector<2x8xf32>
    %35 = vector.multi_reduction <add>, %34, %cst_26 [2] : vector<2x8x8xf32> to vector<2x8xf32>
    %36 = vector.shape_cast %35 : vector<2x8xf32> to vector<2x8x1xf32>
    %37 = tpu.reciprocal %36 {approx = true} : vector<2x8x1xf32> -> vector<2x8x1xf32>
    %38 = vector.broadcast %37 : vector<2x8x1xf32> to vector<2x8x8xf32>
    %39 = arith.mulf %34, %38 : vector<2x8x8xf32>
    "tpu.trace_start"() <{level = 10 : i32, message = "bqk,bkd->bqd"}> : () -> ()
    %cst_27 = arith.constant dense<0.000000e+00> : vector<2x8x8xf32>
    %40 = tpu.matmul %39, %26, %cst_27 {dimension_numbers = #tpu.dot_dimension_numbers<[2], [1], [1], [2], [0, 0, 0, 1, 1, 2], [0], [0]>} : vector<2x8x8xf32>, vector<2x8x8xf32>, vector<2x8x8xf32> -> vector<2x8x8xf32>
    "tpu.trace_stop"() : () -> ()
    %41 = vector.shape_cast %40 : vector<2x8x8xf32> to vector<16x8xf32>
    %c0_28 = arith.constant 0 : index
    %c0_29 = arith.constant 0 : index
    %c0_30 = arith.constant 0 : index
    %42 = vector.load %arg7[%c0_28, %c0_29, %c0_30] : memref<4x8x32xf32, #tpu.memory_space<vmem>>, vector<1x8x32xf32>
    %43 = vector.shape_cast %42 : vector<1x8x32xf32> to vector<8x32xf32>
    %cst_31 = arith.constant dense<0.000000e+00> : vector<16x32xf32>
    %44 = tpu.matmul %41, %43, %cst_31 {dimension_numbers = #tpu.dot_dimension_numbers<[1], [0], [0], [1], [0, 0, 1, 1], [], []>} : vector<16x8xf32>, vector<8x32xf32>, vector<16x32xf32> -> vector<16x32xf32>
    %45 = arith.addf %2, %44 : vector<16x32xf32>
    %c1 = arith.constant 1 : index
    %c0_32 = arith.constant 0 : index
    %c0_33 = arith.constant 0 : index
    %46 = vector.load %arg1[%c1, %c0_32, %c0_33] : memref<4x32x8xf32, #tpu.memory_space<vmem>>, vector<1x32x8xf32>
    %47 = vector.shape_cast %46 : vector<1x32x8xf32> to vector<32x8xf32>
    %cst_34 = arith.constant dense<0.000000e+00> : vector<16x8xf32>
    %48 = tpu.matmul %1, %47, %cst_34 {dimension_numbers = #tpu.dot_dimension_numbers<[1], [0], [0], [1], [0, 0, 1, 1], [], []>} : vector<16x32xf32>, vector<32x8xf32>, vector<16x8xf32> -> vector<16x8xf32>
    %c1_35 = arith.constant 1 : index
    %c0_36 = arith.constant 0 : index
    %c0_37 = arith.constant 0 : index
    %49 = vector.load %arg4[%c1_35, %c0_36, %c0_37] : memref<4x1x8xf32, #tpu.memory_space<vmem>>, vector<1x1x8xf32>
    %50 = vector.shape_cast %49 : vector<1x1x8xf32> to vector<1x8xf32>
    %51 = vector.broadcast %50 : vector<1x8xf32> to vector<16x8xf32>
    %52 = arith.addf %48, %51 : vector<16x8xf32>
    %53 = vector.shape_cast %52 : vector<16x8xf32> to vector<2x8x8xf32>
    %c1_38 = arith.constant 1 : index
    %c0_39 = arith.constant 0 : index
    %c0_40 = arith.constant 0 : index
    %54 = vector.load %arg2[%c1_38, %c0_39, %c0_40] : memref<4x32x8xf32, #tpu.memory_space<vmem>>, vector<1x32x8xf32>
    %55 = vector.shape_cast %54 : vector<1x32x8xf32> to vector<32x8xf32>
    %cst_41 = arith.constant dense<0.000000e+00> : vector<16x8xf32>
    %56 = tpu.matmul %1, %55, %cst_41 {dimension_numbers = #tpu.dot_dimension_numbers<[1], [0], [0], [1], [0, 0, 1, 1], [], []>} : vector<16x32xf32>, vector<32x8xf32>, vector<16x8xf32> -> vector<16x8xf32>
    %c1_42 = arith.constant 1 : index
    %c0_43 = arith.constant 0 : index
    %c0_44 = arith.constant 0 : index
    %57 = vector.load %arg5[%c1_42, %c0_43, %c0_44] : memref<4x1x8xf32, #tpu.memory_space<vmem>>, vector<1x1x8xf32>
    %58 = vector.shape_cast %57 : vector<1x1x8xf32> to vector<1x8xf32>
    %59 = vector.broadcast %58 : vector<1x8xf32> to vector<16x8xf32>
    %60 = arith.addf %56, %59 : vector<16x8xf32>
    %61 = vector.shape_cast %60 : vector<16x8xf32> to vector<2x8x8xf32>
    %c1_45 = arith.constant 1 : index
    %c0_46 = arith.constant 0 : index
    %c0_47 = arith.constant 0 : index
    %62 = vector.load %arg3[%c1_45, %c0_46, %c0_47] : memref<4x32x8xf32, #tpu.memory_space<vmem>>, vector<1x32x8xf32>
    %63 = vector.shape_cast %62 : vector<1x32x8xf32> to vector<32x8xf32>
    %cst_48 = arith.constant dense<0.000000e+00> : vector<16x8xf32>
    %64 = tpu.matmul %1, %63, %cst_48 {dimension_numbers = #tpu.dot_dimension_numbers<[1], [0], [0], [1], [0, 0, 1, 1], [], []>} : vector<16x32xf32>, vector<32x8xf32>, vector<16x8xf32> -> vector<16x8xf32>
    %c1_49 = arith.constant 1 : index
    %c0_50 = arith.constant 0 : index
    %c0_51 = arith.constant 0 : index
    %65 = vector.load %arg6[%c1_49, %c0_50, %c0_51] : memref<4x1x8xf32, #tpu.memory_space<vmem>>, vector<1x1x8xf32>
    %66 = vector.shape_cast %65 : vector<1x1x8xf32> to vector<1x8xf32>
    %67 = vector.broadcast %66 : vector<1x8xf32> to vector<16x8xf32>
    %68 = arith.addf %64, %67 : vector<16x8xf32>
    %69 = vector.shape_cast %68 : vector<16x8xf32> to vector<2x8x8xf32>
    "tpu.trace_start"() <{level = 10 : i32, message = "bqd,bkd->bqk"}> : () -> ()
    %cst_52 = arith.constant dense<0.000000e+00> : vector<2x8x8xf32>
    %70 = tpu.matmul %53, %61, %cst_52 {dimension_numbers = #tpu.dot_dimension_numbers<[2], [2], [1], [1], [0, 0, 0, 1, 1, 1], [0], [0]>} : vector<2x8x8xf32>, vector<2x8x8xf32>, vector<2x8x8xf32> -> vector<2x8x8xf32>
    "tpu.trace_stop"() : () -> ()
    %cst_53 = arith.constant 0.353553385 : f32
    %71 = vector.broadcast %cst_53 : f32 to vector<2x8x8xf32>
    %72 = arith.mulf %70, %71 : vector<2x8x8xf32>
    %cst_54 = arith.constant dense<0xFF800000> : vector<2x8xf32>
    %73 = vector.multi_reduction <maximumf>, %72, %cst_54 [2] : vector<2x8x8xf32> to vector<2x8xf32>
    %74 = vector.shape_cast %73 : vector<2x8xf32> to vector<2x8x1xf32>
    %75 = vector.broadcast %74 : vector<2x8x1xf32> to vector<2x8x8xf32>
    %76 = arith.subf %72, %75 : vector<2x8x8xf32>
    %77 = math.exp %76 : vector<2x8x8xf32>
    %cst_55 = arith.constant dense<0.000000e+00> : vector<2x8xf32>
    %78 = vector.multi_reduction <add>, %77, %cst_55 [2] : vector<2x8x8xf32> to vector<2x8xf32>
    %79 = vector.shape_cast %78 : vector<2x8xf32> to vector<2x8x1xf32>
    %80 = tpu.reciprocal %79 {approx = true} : vector<2x8x1xf32> -> vector<2x8x1xf32>
    %81 = vector.broadcast %80 : vector<2x8x1xf32> to vector<2x8x8xf32>
    %82 = arith.mulf %77, %81 : vector<2x8x8xf32>
    "tpu.trace_start"() <{level = 10 : i32, message = "bqk,bkd->bqd"}> : () -> ()
    %cst_56 = arith.constant dense<0.000000e+00> : vector<2x8x8xf32>
    %83 = tpu.matmul %82, %69, %cst_56 {dimension_numbers = #tpu.dot_dimension_numbers<[2], [1], [1], [2], [0, 0, 0, 1, 1, 2], [0], [0]>} : vector<2x8x8xf32>, vector<2x8x8xf32>, vector<2x8x8xf32> -> vector<2x8x8xf32>
    "tpu.trace_stop"() : () -> ()
    %84 = vector.shape_cast %83 : vector<2x8x8xf32> to vector<16x8xf32>
    %c1_57 = arith.constant 1 : index
    %c0_58 = arith.constant 0 : index
    %c0_59 = arith.constant 0 : index
    %85 = vector.load %arg7[%c1_57, %c0_58, %c0_59] : memref<4x8x32xf32, #tpu.memory_space<vmem>>, vector<1x8x32xf32>
    %86 = vector.shape_cast %85 : vector<1x8x32xf32> to vector<8x32xf32>
    %cst_60 = arith.constant dense<0.000000e+00> : vector<16x32xf32>
    %87 = tpu.matmul %84, %86, %cst_60 {dimension_numbers = #tpu.dot_dimension_numbers<[1], [0], [0], [1], [0, 0, 1, 1], [], []>} : vector<16x8xf32>, vector<8x32xf32>, vector<16x32xf32> -> vector<16x32xf32>
    %88 = arith.addf %45, %87 : vector<16x32xf32>
    %c2 = arith.constant 2 : index
    %c0_61 = arith.constant 0 : index
    %c0_62 = arith.constant 0 : index
    %89 = vector.load %arg1[%c2, %c0_61, %c0_62] : memref<4x32x8xf32, #tpu.memory_space<vmem>>, vector<1x32x8xf32>
    %90 = vector.shape_cast %89 : vector<1x32x8xf32> to vector<32x8xf32>
    %cst_63 = arith.constant dense<0.000000e+00> : vector<16x8xf32>
    %91 = tpu.matmul %1, %90, %cst_63 {dimension_numbers = #tpu.dot_dimension_numbers<[1], [0], [0], [1], [0, 0, 1, 1], [], []>} : vector<16x32xf32>, vector<32x8xf32>, vector<16x8xf32> -> vector<16x8xf32>
    %c2_64 = arith.constant 2 : index
    %c0_65 = arith.constant 0 : index
    %c0_66 = arith.constant 0 : index
    %92 = vector.load %arg4[%c2_64, %c0_65, %c0_66] : memref<4x1x8xf32, #tpu.memory_space<vmem>>, vector<1x1x8xf32>
    %93 = vector.shape_cast %92 : vector<1x1x8xf32> to vector<1x8xf32>
    %94 = vector.broadcast %93 : vector<1x8xf32> to vector<16x8xf32>
    %95 = arith.addf %91, %94 : vector<16x8xf32>
    %96 = vector.shape_cast %95 : vector<16x8xf32> to vector<2x8x8xf32>
    %c2_67 = arith.constant 2 : index
    %c0_68 = arith.constant 0 : index
    %c0_69 = arith.constant 0 : index
    %97 = vector.load %arg2[%c2_67, %c0_68, %c0_69] : memref<4x32x8xf32, #tpu.memory_space<vmem>>, vector<1x32x8xf32>
    %98 = vector.shape_cast %97 : vector<1x32x8xf32> to vector<32x8xf32>
    %cst_70 = arith.constant dense<0.000000e+00> : vector<16x8xf32>
    %99 = tpu.matmul %1, %98, %cst_70 {dimension_numbers = #tpu.dot_dimension_numbers<[1], [0], [0], [1], [0, 0, 1, 1], [], []>} : vector<16x32xf32>, vector<32x8xf32>, vector<16x8xf32> -> vector<16x8xf32>
    %c2_71 = arith.constant 2 : index
    %c0_72 = arith.constant 0 : index
    %c0_73 = arith.constant 0 : index
    %100 = vector.load %arg5[%c2_71, %c0_72, %c0_73] : memref<4x1x8xf32, #tpu.memory_space<vmem>>, vector<1x1x8xf32>
    %101 = vector.shape_cast %100 : vector<1x1x8xf32> to vector<1x8xf32>
    %102 = vector.broadcast %101 : vector<1x8xf32> to vector<16x8xf32>
    %103 = arith.addf %99, %102 : vector<16x8xf32>
    %104 = vector.shape_cast %103 : vector<16x8xf32> to vector<2x8x8xf32>
    %c2_74 = arith.constant 2 : index
    %c0_75 = arith.constant 0 : index
    %c0_76 = arith.constant 0 : index
    %105 = vector.load %arg3[%c2_74, %c0_75, %c0_76] : memref<4x32x8xf32, #tpu.memory_space<vmem>>, vector<1x32x8xf32>
    %106 = vector.shape_cast %105 : vector<1x32x8xf32> to vector<32x8xf32>
    %cst_77 = arith.constant dense<0.000000e+00> : vector<16x8xf32>
    %107 = tpu.matmul %1, %106, %cst_77 {dimension_numbers = #tpu.dot_dimension_numbers<[1], [0], [0], [1], [0, 0, 1, 1], [], []>} : vector<16x32xf32>, vector<32x8xf32>, vector<16x8xf32> -> vector<16x8xf32>
    %c2_78 = arith.constant 2 : index
    %c0_79 = arith.constant 0 : index
    %c0_80 = arith.constant 0 : index
    %108 = vector.load %arg6[%c2_78, %c0_79, %c0_80] : memref<4x1x8xf32, #tpu.memory_space<vmem>>, vector<1x1x8xf32>
    %109 = vector.shape_cast %108 : vector<1x1x8xf32> to vector<1x8xf32>
    %110 = vector.broadcast %109 : vector<1x8xf32> to vector<16x8xf32>
    %111 = arith.addf %107, %110 : vector<16x8xf32>
    %112 = vector.shape_cast %111 : vector<16x8xf32> to vector<2x8x8xf32>
    "tpu.trace_start"() <{level = 10 : i32, message = "bqd,bkd->bqk"}> : () -> ()
    %cst_81 = arith.constant dense<0.000000e+00> : vector<2x8x8xf32>
    %113 = tpu.matmul %96, %104, %cst_81 {dimension_numbers = #tpu.dot_dimension_numbers<[2], [2], [1], [1], [0, 0, 0, 1, 1, 1], [0], [0]>} : vector<2x8x8xf32>, vector<2x8x8xf32>, vector<2x8x8xf32> -> vector<2x8x8xf32>
    "tpu.trace_stop"() : () -> ()
    %cst_82 = arith.constant 0.353553385 : f32
    %114 = vector.broadcast %cst_82 : f32 to vector<2x8x8xf32>
    %115 = arith.mulf %113, %114 : vector<2x8x8xf32>
    %cst_83 = arith.constant dense<0xFF800000> : vector<2x8xf32>
    %116 = vector.multi_reduction <maximumf>, %115, %cst_83 [2] : vector<2x8x8xf32> to vector<2x8xf32>
    %117 = vector.shape_cast %116 : vector<2x8xf32> to vector<2x8x1xf32>
    %118 = vector.broadcast %117 : vector<2x8x1xf32> to vector<2x8x8xf32>
    %119 = arith.subf %115, %118 : vector<2x8x8xf32>
    %120 = math.exp %119 : vector<2x8x8xf32>
    %cst_84 = arith.constant dense<0.000000e+00> : vector<2x8xf32>
    %121 = vector.multi_reduction <add>, %120, %cst_84 [2] : vector<2x8x8xf32> to vector<2x8xf32>
    %122 = vector.shape_cast %121 : vector<2x8xf32> to vector<2x8x1xf32>
    %123 = tpu.reciprocal %122 {approx = true} : vector<2x8x1xf32> -> vector<2x8x1xf32>
    %124 = vector.broadcast %123 : vector<2x8x1xf32> to vector<2x8x8xf32>
    %125 = arith.mulf %120, %124 : vector<2x8x8xf32>
    "tpu.trace_start"() <{level = 10 : i32, message = "bqk,bkd->bqd"}> : () -> ()
    %cst_85 = arith.constant dense<0.000000e+00> : vector<2x8x8xf32>
    %126 = tpu.matmul %125, %112, %cst_85 {dimension_numbers = #tpu.dot_dimension_numbers<[2], [1], [1], [2], [0, 0, 0, 1, 1, 2], [0], [0]>} : vector<2x8x8xf32>, vector<2x8x8xf32>, vector<2x8x8xf32> -> vector<2x8x8xf32>
    "tpu.trace_stop"() : () -> ()
    %127 = vector.shape_cast %126 : vector<2x8x8xf32> to vector<16x8xf32>
    %c2_86 = arith.constant 2 : index
    %c0_87 = arith.constant 0 : index
    %c0_88 = arith.constant 0 : index
    %128 = vector.load %arg7[%c2_86, %c0_87, %c0_88] : memref<4x8x32xf32, #tpu.memory_space<vmem>>, vector<1x8x32xf32>
    %129 = vector.shape_cast %128 : vector<1x8x32xf32> to vector<8x32xf32>
    %cst_89 = arith.constant dense<0.000000e+00> : vector<16x32xf32>
    %130 = tpu.matmul %127, %129, %cst_89 {dimension_numbers = #tpu.dot_dimension_numbers<[1], [0], [0], [1], [0, 0, 1, 1], [], []>} : vector<16x8xf32>, vector<8x32xf32>, vector<16x32xf32> -> vector<16x32xf32>
    %131 = arith.addf %88, %130 : vector<16x32xf32>
    %c3 = arith.constant 3 : index
    %c0_90 = arith.constant 0 : index
    %c0_91 = arith.constant 0 : index
    %132 = vector.load %arg1[%c3, %c0_90, %c0_91] : memref<4x32x8xf32, #tpu.memory_space<vmem>>, vector<1x32x8xf32>
    %133 = vector.shape_cast %132 : vector<1x32x8xf32> to vector<32x8xf32>
    %cst_92 = arith.constant dense<0.000000e+00> : vector<16x8xf32>
    %134 = tpu.matmul %1, %133, %cst_92 {dimension_numbers = #tpu.dot_dimension_numbers<[1], [0], [0], [1], [0, 0, 1, 1], [], []>} : vector<16x32xf32>, vector<32x8xf32>, vector<16x8xf32> -> vector<16x8xf32>
    %c3_93 = arith.constant 3 : index
    %c0_94 = arith.constant 0 : index
    %c0_95 = arith.constant 0 : index
    %135 = vector.load %arg4[%c3_93, %c0_94, %c0_95] : memref<4x1x8xf32, #tpu.memory_space<vmem>>, vector<1x1x8xf32>
    %136 = vector.shape_cast %135 : vector<1x1x8xf32> to vector<1x8xf32>
    %137 = vector.broadcast %136 : vector<1x8xf32> to vector<16x8xf32>
    %138 = arith.addf %134, %137 : vector<16x8xf32>
    %139 = vector.shape_cast %138 : vector<16x8xf32> to vector<2x8x8xf32>
    %c3_96 = arith.constant 3 : index
    %c0_97 = arith.constant 0 : index
    %c0_98 = arith.constant 0 : index
    %140 = vector.load %arg2[%c3_96, %c0_97, %c0_98] : memref<4x32x8xf32, #tpu.memory_space<vmem>>, vector<1x32x8xf32>
    %141 = vector.shape_cast %140 : vector<1x32x8xf32> to vector<32x8xf32>
    %cst_99 = arith.constant dense<0.000000e+00> : vector<16x8xf32>
    %142 = tpu.matmul %1, %141, %cst_99 {dimension_numbers = #tpu.dot_dimension_numbers<[1], [0], [0], [1], [0, 0, 1, 1], [], []>} : vector<16x32xf32>, vector<32x8xf32>, vector<16x8xf32> -> vector<16x8xf32>
    %c3_100 = arith.constant 3 : index
    %c0_101 = arith.constant 0 : index
    %c0_102 = arith.constant 0 : index
    %143 = vector.load %arg5[%c3_100, %c0_101, %c0_102] : memref<4x1x8xf32, #tpu.memory_space<vmem>>, vector<1x1x8xf32>
    %144 = vector.shape_cast %143 : vector<1x1x8xf32> to vector<1x8xf32>
    %145 = vector.broadcast %144 : vector<1x8xf32> to vector<16x8xf32>
    %146 = arith.addf %142, %145 : vector<16x8xf32>
    %147 = vector.shape_cast %146 : vector<16x8xf32> to vector<2x8x8xf32>
    %c3_103 = arith.constant 3 : index
    %c0_104 = arith.constant 0 : index
    %c0_105 = arith.constant 0 : index
    %148 = vector.load %arg3[%c3_103, %c0_104, %c0_105] : memref<4x32x8xf32, #tpu.memory_space<vmem>>, vector<1x32x8xf32>
    %149 = vector.shape_cast %148 : vector<1x32x8xf32> to vector<32x8xf32>
    %cst_106 = arith.constant dense<0.000000e+00> : vector<16x8xf32>
    %150 = tpu.matmul %1, %149, %cst_106 {dimension_numbers = #tpu.dot_dimension_numbers<[1], [0], [0], [1], [0, 0, 1, 1], [], []>} : vector<16x32xf32>, vector<32x8xf32>, vector<16x8xf32> -> vector<16x8xf32>
    %c3_107 = arith.constant 3 : index
    %c0_108 = arith.constant 0 : index
    %c0_109 = arith.constant 0 : index
    %151 = vector.load %arg6[%c3_107, %c0_108, %c0_109] : memref<4x1x8xf32, #tpu.memory_space<vmem>>, vector<1x1x8xf32>
    %152 = vector.shape_cast %151 : vector<1x1x8xf32> to vector<1x8xf32>
    %153 = vector.broadcast %152 : vector<1x8xf32> to vector<16x8xf32>
    %154 = arith.addf %150, %153 : vector<16x8xf32>
    %155 = vector.shape_cast %154 : vector<16x8xf32> to vector<2x8x8xf32>
    "tpu.trace_start"() <{level = 10 : i32, message = "bqd,bkd->bqk"}> : () -> ()
    %cst_110 = arith.constant dense<0.000000e+00> : vector<2x8x8xf32>
    %156 = tpu.matmul %139, %147, %cst_110 {dimension_numbers = #tpu.dot_dimension_numbers<[2], [2], [1], [1], [0, 0, 0, 1, 1, 1], [0], [0]>} : vector<2x8x8xf32>, vector<2x8x8xf32>, vector<2x8x8xf32> -> vector<2x8x8xf32>
    "tpu.trace_stop"() : () -> ()
    %cst_111 = arith.constant 0.353553385 : f32
    %157 = vector.broadcast %cst_111 : f32 to vector<2x8x8xf32>
    %158 = arith.mulf %156, %157 : vector<2x8x8xf32>
    %cst_112 = arith.constant dense<0xFF800000> : vector<2x8xf32>
    %159 = vector.multi_reduction <maximumf>, %158, %cst_112 [2] : vector<2x8x8xf32> to vector<2x8xf32>
    %160 = vector.shape_cast %159 : vector<2x8xf32> to vector<2x8x1xf32>
    %161 = vector.broadcast %160 : vector<2x8x1xf32> to vector<2x8x8xf32>
    %162 = arith.subf %158, %161 : vector<2x8x8xf32>
    %163 = math.exp %162 : vector<2x8x8xf32>
    %cst_113 = arith.constant dense<0.000000e+00> : vector<2x8xf32>
    %164 = vector.multi_reduction <add>, %163, %cst_113 [2] : vector<2x8x8xf32> to vector<2x8xf32>
    %165 = vector.shape_cast %164 : vector<2x8xf32> to vector<2x8x1xf32>
    %166 = tpu.reciprocal %165 {approx = true} : vector<2x8x1xf32> -> vector<2x8x1xf32>
    %167 = vector.broadcast %166 : vector<2x8x1xf32> to vector<2x8x8xf32>
    %168 = arith.mulf %163, %167 : vector<2x8x8xf32>
    "tpu.trace_start"() <{level = 10 : i32, message = "bqk,bkd->bqd"}> : () -> ()
    %cst_114 = arith.constant dense<0.000000e+00> : vector<2x8x8xf32>
    %169 = tpu.matmul %168, %155, %cst_114 {dimension_numbers = #tpu.dot_dimension_numbers<[2], [1], [1], [2], [0, 0, 0, 1, 1, 2], [0], [0]>} : vector<2x8x8xf32>, vector<2x8x8xf32>, vector<2x8x8xf32> -> vector<2x8x8xf32>
    "tpu.trace_stop"() : () -> ()
    %170 = vector.shape_cast %169 : vector<2x8x8xf32> to vector<16x8xf32>
    %c3_115 = arith.constant 3 : index
    %c0_116 = arith.constant 0 : index
    %c0_117 = arith.constant 0 : index
    %171 = vector.load %arg7[%c3_115, %c0_116, %c0_117] : memref<4x8x32xf32, #tpu.memory_space<vmem>>, vector<1x8x32xf32>
    %172 = vector.shape_cast %171 : vector<1x8x32xf32> to vector<8x32xf32>
    %cst_118 = arith.constant dense<0.000000e+00> : vector<16x32xf32>
    %173 = tpu.matmul %170, %172, %cst_118 {dimension_numbers = #tpu.dot_dimension_numbers<[1], [0], [0], [1], [0, 0, 1, 1], [], []>} : vector<16x8xf32>, vector<8x32xf32>, vector<16x32xf32> -> vector<16x32xf32>
    %174 = arith.addf %131, %173 : vector<16x32xf32>
    %c0_119 = arith.constant 0 : index
    %c0_120 = arith.constant 0 : index
    %175 = vector.load %arg8[%c0_119, %c0_120] : memref<1x32xf32, #tpu.memory_space<vmem>>, vector<1x32xf32>
    %176 = vector.broadcast %175 : vector<1x32xf32> to vector<16x32xf32>
    %177 = arith.addf %174, %176 : vector<16x32xf32>
    %178 = arith.addf %1, %177 : vector<16x32xf32>
    %cst_121 = arith.constant dense<0.000000e+00> : vector<16xf32>
    %179 = vector.multi_reduction <add>, %178, %cst_121 [1] : vector<16x32xf32> to vector<16xf32>
    %180 = vector.shape_cast %179 : vector<16xf32> to vector<16x1xf32>
    %cst_122 = arith.constant 3.200000e+01 : f32
    %181 = vector.broadcast %cst_122 : f32 to vector<16x1xf32>
    %182 = arith.divf %180, %181 : vector<16x1xf32>
    %183 = vector.broadcast %182 : vector<16x1xf32> to vector<16x32xf32>
    %184 = arith.subf %178, %183 : vector<16x32xf32>
    %185 = arith.mulf %184, %184 : vector<16x32xf32>
    %cst_123 = arith.constant dense<0.000000e+00> : vector<16xf32>
    %186 = vector.multi_reduction <add>, %185, %cst_123 [1] : vector<16x32xf32> to vector<16xf32>
    %187 = vector.shape_cast %186 : vector<16xf32> to vector<16x1xf32>
    %cst_124 = arith.constant 3.200000e+01 : f32
    %188 = vector.broadcast %cst_124 : f32 to vector<16x1xf32>
    %189 = arith.divf %187, %188 : vector<16x1xf32>
    %190 = vector.broadcast %182 : vector<16x1xf32> to vector<16x32xf32>
    %191 = arith.subf %178, %190 : vector<16x32xf32>
    %cst_125 = arith.constant 9.99999974E-6 : f32
    %192 = vector.broadcast %cst_125 : f32 to vector<16x1xf32>
    %193 = arith.addf %189, %192 : vector<16x1xf32>
    %194 = math.rsqrt %193 : vector<16x1xf32>
    %195 = vector.broadcast %194 : vector<16x1xf32> to vector<16x32xf32>
    %196 = arith.mulf %191, %195 : vector<16x32xf32>
    %c0_126 = arith.constant 0 : index
    %c0_127 = arith.constant 0 : index
    %197 = vector.load %arg9[%c0_126, %c0_127] : memref<1x32xf32, #tpu.memory_space<vmem>>, vector<1x32xf32>
    %198 = vector.broadcast %197 : vector<1x32xf32> to vector<16x32xf32>
    %199 = arith.mulf %196, %198 : vector<16x32xf32>
    %c0_128 = arith.constant 0 : index
    %c0_129 = arith.constant 0 : index
    %200 = vector.load %arg10[%c0_128, %c0_129] : memref<1x32xf32, #tpu.memory_space<vmem>>, vector<1x32xf32>
    %201 = vector.broadcast %200 : vector<1x32xf32> to vector<16x32xf32>
    %202 = arith.addf %199, %201 : vector<16x32xf32>
    %c0_130 = arith.constant 0 : index
    %c0_131 = arith.constant 0 : index
    %203 = vector.load %arg11[%c0_130, %c0_131] : memref<32x64xf32, #tpu.memory_space<vmem>>, vector<32x64xf32>
    %cst_132 = arith.constant dense<0.000000e+00> : vector<16x64xf32>
    %204 = tpu.matmul %202, %203, %cst_132 {dimension_numbers = #tpu.dot_dimension_numbers<[1], [0], [0], [1], [0, 0, 1, 1], [], []>} : vector<16x32xf32>, vector<32x64xf32>, vector<16x64xf32> -> vector<16x64xf32>
    %c0_133 = arith.constant 0 : index
    %c0_134 = arith.constant 0 : index
    %205 = vector.load %arg12[%c0_133, %c0_134] : memref<1x64xf32, #tpu.memory_space<vmem>>, vector<1x64xf32>
    %206 = vector.broadcast %205 : vector<1x64xf32> to vector<16x64xf32>
    %207 = arith.addf %204, %206 : vector<16x64xf32>
    %cst_135 = arith.constant 0.000000e+00 : f32
    %208 = vector.broadcast %cst_135 : f32 to vector<16x64xf32>
    %209 = arith.maximumf %207, %208 : vector<16x64xf32>
    %c0_136 = arith.constant 0 : index
    %c0_137 = arith.constant 0 : index
    %210 = vector.load %arg13[%c0_136, %c0_137] : memref<64x32xf32, #tpu.memory_space<vmem>>, vector<64x32xf32>
    %cst_138 = arith.constant dense<0.000000e+00> : vector<16x32xf32>
    %211 = tpu.matmul %209, %210, %cst_138 {dimension_numbers = #tpu.dot_dimension_numbers<[1], [0], [0], [1], [0, 0, 1, 1], [], []>} : vector<16x64xf32>, vector<64x32xf32>, vector<16x32xf32> -> vector<16x32xf32>
    %c0_139 = arith.constant 0 : index
    %c0_140 = arith.constant 0 : index
    %212 = vector.load %arg14[%c0_139, %c0_140] : memref<1x32xf32, #tpu.memory_space<vmem>>, vector<1x32xf32>
    %213 = vector.broadcast %212 : vector<1x32xf32> to vector<16x32xf32>
    %214 = arith.addf %211, %213 : vector<16x32xf32>
    %215 = arith.addf %202, %214 : vector<16x32xf32>
    %cst_141 = arith.constant dense<0.000000e+00> : vector<16xf32>
    %216 = vector.multi_reduction <add>, %215, %cst_141 [1] : vector<16x32xf32> to vector<16xf32>
    %217 = vector.shape_cast %216 : vector<16xf32> to vector<16x1xf32>
    %cst_142 = arith.constant 3.200000e+01 : f32
    %218 = vector.broadcast %cst_142 : f32 to vector<16x1xf32>
    %219 = arith.divf %217, %218 : vector<16x1xf32>
    %220 = vector.broadcast %219 : vector<16x1xf32> to vector<16x32xf32>
    %221 = arith.subf %215, %220 : vector<16x32xf32>
    %222 = arith.mulf %221, %221 : vector<16x32xf32>
    %cst_143 = arith.constant dense<0.000000e+00> : vector<16xf32>
    %223 = vector.multi_reduction <add>, %222, %cst_143 [1] : vector<16x32xf32> to vector<16xf32>
    %224 = vector.shape_cast %223 : vector<16xf32> to vector<16x1xf32>
    %cst_144 = arith.constant 3.200000e+01 : f32
    %225 = vector.broadcast %cst_144 : f32 to vector<16x1xf32>
    %226 = arith.divf %224, %225 : vector<16x1xf32>
    %227 = vector.broadcast %219 : vector<16x1xf32> to vector<16x32xf32>
    %228 = arith.subf %215, %227 : vector<16x32xf32>
    %cst_145 = arith.constant 9.99999974E-6 : f32
    %229 = vector.broadcast %cst_145 : f32 to vector<16x1xf32>
    %230 = arith.addf %226, %229 : vector<16x1xf32>
    %231 = math.rsqrt %230 : vector<16x1xf32>
    %232 = vector.broadcast %231 : vector<16x1xf32> to vector<16x32xf32>
    %233 = arith.mulf %228, %232 : vector<16x32xf32>
    %c0_146 = arith.constant 0 : index
    %c0_147 = arith.constant 0 : index
    %234 = vector.load %arg15[%c0_146, %c0_147] : memref<1x32xf32, #tpu.memory_space<vmem>>, vector<1x32xf32>
    %235 = vector.broadcast %234 : vector<1x32xf32> to vector<16x32xf32>
    %236 = arith.mulf %233, %235 : vector<16x32xf32>
    %c0_148 = arith.constant 0 : index
    %c0_149 = arith.constant 0 : index
    %237 = vector.load %arg16[%c0_148, %c0_149] : memref<1x32xf32, #tpu.memory_space<vmem>>, vector<1x32xf32>
    %238 = vector.broadcast %237 : vector<1x32xf32> to vector<16x32xf32>
    %239 = arith.addf %236, %238 : vector<16x32xf32>
    %c0_150 = arith.constant 0 : index
    %c0_151 = arith.constant 0 : index
    %240 = vector.load %arg17[%c0_150, %c0_151] : memref<16x32xf32, #tpu.memory_space<vmem>>, vector<16x32xf32>
    tpu.vector_store %arg17[%c0_150, %c0_151], %239 {strides = array<i32>} : memref<16x32xf32, #tpu.memory_space<vmem>>, vector<16x32xf32>,
    return
  }
}

</mosaic_0001>

<bundles_post_ra>
// kernel: encoder_block.1
= control target key start
LH: loop header
LB: loop body
LE: loop exit
PB: predicated region body
PF: predicated region fallthrough
CT: control target
= control target key end

     0   :  { %s1986_s0 = inlined_call_operand.vmem [shape: f32[2,8,32], index: 0, kind: input, shape index: {}]   ;;  %s1987_s1 = inlined_call_operand.vmem [shape: f32[4,32,8], index: 1, kind: input, shape index: {}]   ;;  %s1988_s2 = inlined_call_operand.vmem [shape: f32[4,32,8], index: 2, kind: input, shape index: {}]   ;;  %s1989_s3 = inlined_call_operand.vmem [shape: f32[4,32,8], index: 3, kind: input, shape index: {}]   ;;  %s1990_s4 = inlined_call_operand.vmem [shape: f32[4,1,8], index: 4, kind: input, shape index: {}]   ;;  %s1991_s5 = inlined_call_operand.vmem [shape: f32[4,1,8], index: 5, kind: input, shape index: {}]   ;;  %s1992_s6 = inlined_call_operand.vmem [shape: f32[4,1,8], index: 6, kind: input, shape index: {}]   ;;  %s1993_s7 = inlined_call_operand.vmem [shape: f32[4,8,32], index: 7, kind: input, shape index: {}]   ;;  %s1994_s8 = inlined_call_operand.vmem [shape: f32[1,32], index: 8, kind: input, shape index: {}]   ;;  %s1995_s9 = inlined_call_operand.vmem [shape: f32[1,32], index: 9, kind: input, shape index: {}]   ;;  %s1996_s10 = inlined_call_operand.vmem [shape: f32[1,32], index: 10, kind: input, shape index: {}]   ;;  %s1997_s11 = inlined_call_operand.vmem [shape: f32[32,64], index: 11, kind: input, shape index: {}]   ;;  %s1998_s12 = inlined_call_operand.vmem [shape: f32[1,64], index: 12, kind: input, shape index: {}]   ;;  %s1999_s13 = inlined_call_operand.vmem [shape: f32[64,32], index: 13, kind: input, shape index: {}]   ;;  %s2000_s14 = inlined_call_operand.vmem [shape: f32[1,32], index: 14, kind: input, shape index: {}]   ;;  %s2001_s15 = inlined_call_operand.vmem [shape: f32[1,32], index: 15, kind: input, shape index: {}]   ;;  %s2002_s16 = inlined_call_operand.vmem [shape: f32[1,32], index: 16, kind: input, shape index: {}]   ;;  %s2003_s17 = inlined_call_operand.hbm [shape: f32[16,32], index: 17, kind: output, shape index: {}]  }
   0x1   :  { %2006 = sst [smem:[#allocation5_spill]] %s1986_s0 }
   0x2   :  { %2007 = sst [smem:[#allocation6_spill]] %s1987_s1 }
   0x3   :  { %v100_v0 = vld [vmem:[%s1988_s2 + $0x18] sm:$0xff]  ;;  %v99_v1 = vld [vmem:[%s1988_s2 + $0x10] sm:$0xff]  ;;  %s2008_s0 = sld [smem:[#allocation6_spill]]  ;;  %v98_v4 = vld [vmem:[%s1988_s2 + $0x8] sm:$0xff]  ;;  %vm67_vm0 = vcmask 261120  }
   0x4   :  { %117 = vmatpush.msra.mxu1 %v100_v0  ;;  %v97_v5 = vld [vmem:[%s1988_s2] sm:$0xff]  ;;  %s2009_s26 = sld [smem:[#allocation5_spill]] }
   0x6   :  { %118 = vmatpush.msra.mxu1 %v99_v1 }
   0x8   :  { %119 = vmatpush.msra.mxu1 %v98_v4 }
   0x9   :  { %v62_v2 = vld [vmem:[%s2008_s0 + $0x18] sm:$0xff]  ;;  %v61_v3 = vld [vmem:[%s2008_s0 + $0x10] sm:$0xff]  ;;  %v60_v6 = vld [vmem:[%s2008_s0 + $0x8] sm:$0xff] }
   0xa   :  { %86 = vmatpush.msra.mxu0 %v62_v2  ;;  %v1619_v7 = vld [vmem:[%s2009_s26] sm:$0xff]  ;;  %120 = vmatpush.msra.mxu1 %v97_v5 }
   0xb   :  { %v59_v8 = vld [vmem:[%s2008_s0] sm:$0xff]  ;;  %1304 = vmatmul.msk.f32.vlgmr.msra.gmra.mxu1 %vm67_vm0, %v1619_v7 }
   0xc   :  { %87 = vmatpush.msra.mxu0 %v61_v3 }
   0xe   :  { %88 = vmatpush.msra.mxu0 %v60_v6 }
  0x10   :  { %89 = vmatpush.msra.mxu0 %v59_v8 }
  0x11   :  { %1302 = vmatmul.msk.f32.vlgmr.msra.gmra.mxu0 %vm67_vm0, %v1619_v7 }
  0x12   :  { %22 = vsyncpa [#allocation3], 0  ;;  %v1631_v9 = vld [vmem:[%s2009_s26 + $0x8] sm:$0xff]  ;;  %v1414_v10 = vld [vmem:[%s1991_s5] ss:$0 sm:$0xff]  ;;  %vm159_vm1 = vcmask 64512  }
  0x13   :  { %1305 = vmatmul.msk.f32.gmra.mxu1 %vm67_vm0, %v1631_v9  ;;  %v1415_v11 = vld [vmem:[%s1990_s4] ss:$0 sm:$0xff]  ;;  %v131_v20 = vld [vmem:[%s1989_s3 + $0x18] sm:$0xff]  ;;  %v130_v21 = vld [vmem:[%s1989_s3 + $0x10] sm:$0xff]  ;;  %vm1194_vm9 = vcmask 523264   ;;  %s1290_s19 = sshll.u32 %s2003_s17, 4  ;;  %s1291_s19 = int_to_ptr.hbm [resolvable:$true] %s1290_s19 }
  0x14   :  { %148 = vmatpush.msra.mxu2 %v131_v20  ;;  %v129_v22 = vld [vmem:[%s1989_s3 + $0x8] sm:$0xff]  ;;  %v128_v23 = vld [vmem:[%s1989_s3] sm:$0xff]  ;;  %v1324_v30 = vld [vmem:[%s1988_s2 + $0x38] sm:$0xff]  ;;  %s1504_s1 = smov 8  }
  0x15   :  { %v1323_v31 = vld [vmem:[%s1988_s2 + $0x30] sm:$0xff]  ;;  %v1322_v32 = vld [vmem:[%s1988_s2 + $0x28] sm:$0xff]  ;;  %v1321_v33 = vld [vmem:[%s1988_s2 + $0x20] sm:$0xff] }
  0x16   :  { %149 = vmatpush.msra.mxu2 %v130_v21  ;;  %v1317_v34 = vld [vmem:[%s2008_s0 + $0x38] sm:$0xff]  ;;  %v1316_v35 = vld [vmem:[%s2008_s0 + $0x30] sm:$0xff]  ;;  %v1315_v36 = vld [vmem:[%s2008_s0 + $0x28] sm:$0xff] }
  0x17   :  { %305 = vmatpush.msrb.mxu1 %v1317_v34  ;;  %v1314_v37 = vld [vmem:[%s2008_s0 + $0x20] sm:$0xff]  ;;  %v1331_v6 = vld [vmem:[%s1989_s3 + $0x38] sm:$0xff]  ;;  %v1330_v8 = vld [vmem:[%s1989_s3 + $0x30] sm:$0xff] }
  0x18   :  { %150 = vmatpush.msra.mxu2 %v129_v22  ;;  %v1416_v48 = vld [vmem:[%s1992_s6] ss:$0 sm:$0xff]  ;;  %v1417_v53 = vld [vmem:[%s1991_s5 + $0x1] ss:$0 sm:$0xff] }
  0x19   :  { %1303 = vmatmul.msk.f32.gmra.mxu0 %vm67_vm0, %v1631_v9  ;;  %306 = vmatpush.msrb.mxu1 %v1316_v35  ;;  %v1418_v1 = vld [vmem:[%s1990_s4 + $0x1] ss:$0 sm:$0xff]  ;;  %v1356_v35 = vld [vmem:[%s1988_s2 + $0x58] sm:$0xff] }
  0x1a   :  { %151 = vmatpush.msra.mxu2 %v128_v23  ;;  %v282_v5 = vld [vmem:[%s1993_s7] sm:$0xff] }
  0x1b   :  { %1306 = vmatmul.msk.f32.vlgmr.msra.gmra.mxu2 %vm67_vm0, %v1619_v7  ;;  %307 = vmatpush.msrb.mxu1 %v1315_v36  ;;  %v1355_v36 = vld [vmem:[%s1988_s2 + $0x50] sm:$0xff] }
  0x1c   :  { %338 = vmatpush.msrb.mxu2 %v1324_v30  ;;  %v1419_v30 = vld [vmem:[%s1992_s6 + $0x1] ss:$0 sm:$0xff] }
  0x1d   :  { %308 = vmatpush.msrb.mxu1 %v1314_v37  ;;  %v1354_v37 = vld [vmem:[%s1988_s2 + $0x48] sm:$0xff] }
  0x1e   :  { %339 = vmatpush.msrb.mxu2 %v1323_v31  ;;  %1319 = vmatmul.msk.f32.vlgmr.msrb.gmra.mxu1 %vm67_vm0, %v1619_v7 }
  0x20   :  { %340 = vmatpush.msrb.mxu2 %v1322_v32 }
  0x22   :  { %341 = vmatpush.msrb.mxu2 %v1321_v33 }
  0x23   :  { %1307 = vmatmul.msk.f32.gmra.mxu2 %vm67_vm0, %v1631_v9 }
  0x26   :  { %1320 = vmatmul.msk.f32.gmra.mxu1 %vm67_vm0, %v1631_v9 }
  0x2b   :  { %1326 = vmatmul.msk.f32.vlgmr.msrb.gmra.mxu2 %vm67_vm0, %v1619_v7 }
  0x33   :  { %1327 = vmatmul.msk.f32.gmra.mxu2 %vm67_vm0, %v1631_v9 }
  0x88   :  { %v122_v12 = vpop.f32.mrf.mxu1 }
  0x89   :  { %v123_v14 = vadd.f32 %v1414_v10, %v122_v12 }
  0x8b   :  { %1308 = vmatpush.xpose.msk.msra.mxu3 %vm159_vm1, %v123_v14 }
  0x8e   :  { %v91_v13 = vpop.f32.mrf.mxu0 }
  0x8f   :  { %v92_v15 = vadd.f32 %v1415_v11, %v91_v13 }
  0x90   :  { %v125_v16 = vpop.f32.mrf.mxu1 }
  0x91   :  { %1309 = vmatmul.msk.f32.vlgmr.msra.gmra.mxu3 %vm159_vm1, %v92_v15  ;;  %v126_v18 = vadd.f32 %v1414_v10, %v125_v16 }
  0x93   :  { %1310 = vmatpush.xpose.msk.msrb.mxu3 %vm159_vm1, %v126_v18  ;;  %v1329_v18 = vld [vmem:[%s1989_s3 + $0x28] sm:$0xff] }
  0x96   :  { %v94_v17 = vpop.f32.mrf.mxu0 }
  0x97   :  { %v95_v19 = vadd.f32 %v1415_v11, %v94_v17 }
  0x99   :  { %1311 = vmatmul.msk.f32.vlgmr.msrb.gmra.mxu3 %vm159_vm1, %v95_v19  ;;  %v1328_v19 = vld [vmem:[%s1989_s3 + $0x20] sm:$0xff] }
  0x9b   :  { %v310_v0 = vpop.f32.mrf.mxu1 }
  0x9c   :  { %v311_v2 = vadd.f32 %v1418_v1, %v310_v0 }
  0x9e   :  { %v153_v49 = vpop.f32.mrf.mxu2 }
  0x9f   :  { %v154_v50 = vadd.f32 %v1416_v48, %v153_v49  ;;  %v1341_v49 = vld [vmem:[%s1993_s7 + $0x8] sm:$0xff] }
  0xa1   :  { %254 = vmatpush.msra.mxu3 %v154_v50 }
  0xa3   :  { %v313_v3 = vpop.f32.mrf.mxu1  ;;  %371 = vmatpush.msrb.mxu3 %v1331_v6 }
  0xa4   :  { %v314_v4 = vadd.f32 %v1418_v1, %v313_v3  ;;  %v1361_v1 = vld [vmem:[%s1989_s3 + $0x48] sm:$0xff] }
  0xa5   :  { %372 = vmatpush.msrb.mxu3 %v1330_v8 }
  0xa6   :  { %v156_v51 = vpop.f32.mrf.mxu2 }
  0xa7   :  { %v157_v52 = vadd.f32 %v1416_v48, %v156_v51  ;;  %373 = vmatpush.msrb.mxu3 %v1329_v18 }
  0xa9   :  { %277 = vmatpush.msrb.mxu0 %v157_v52  ;;  %374 = vmatpush.msrb.mxu3 %v1328_v19  ;;  %v1420_v52 = vld [vmem:[%s1991_s5 + $0x2] ss:$0 sm:$0xff] }
  0xae   :  { %v343_v54 = vpop.f32.mrf.mxu2 }
  0xaf   :  { %v344_v55 = vadd.f32 %v1417_v53, %v343_v54 }
  0xb1   :  { %1335 = vmatpush.xpose.msk.msra.mxu0 %vm159_vm1, %v344_v55 }
  0xb6   :  { %v346_v60 = vpop.f32.mrf.mxu2 }
  0xb7   :  { %v347_v62 = vadd.f32 %v1417_v53, %v346_v60  ;;  %v1421_v53 = vld [vmem:[%s1990_s4 + $0x2] ss:$0 sm:$0xff] }
 0x114   :  { %v183_v24 = vpop.f32.mrf.mxu3 }
 0x115   :  { %v212_v25 = vmul.f32 0.35355338, %v183_v24 }
 0x117   :  { %v214_v26 = vsel %vm159_vm1, %v212_v25, -inf }
 0x118   :  { %215 = vmax.xlane.f32.xlu1 %v214_v26 }
 0x11c   :  { %v209_v27 = vpop.f32.mrf.mxu3 }
 0x11d   :  { %v213_v28 = vmul.f32 0.35355338, %v209_v27 }
 0x11f   :  { %v217_v29 = vsel %vm159_vm1, %v213_v28, -inf }
 0x120   :  { %218 = vmax.xlane.f32.xlu0 %v217_v29 }
 0x18b   :  { %v216_v38 = vpop.xlane.xlu1 %215 }
 0x18c   :  { %v220_v39 = vsub.f32 %v212_v25, %v216_v38  ;;  %v1353_v38 = vld [vmem:[%s1988_s2 + $0x40] sm:$0xff] }
 0x18e   :  { %v222_v40 = vmul.f32 1.442695, %v220_v39  ;;  %v1349_v39 = vld [vmem:[%s2008_s0 + $0x58] sm:$0xff] }
 0x190   :  { %1433 = vpow2.f32 %v222_v40  ;;  %v1348_v40 = vld [vmem:[%s2008_s0 + $0x50] sm:$0xff] }
 0x193   :  { %v219_v41 = vpop.xlane.xlu0 %218 }
 0x194   :  { %v221_v42 = vsub.f32 %v213_v28, %v219_v41  ;;  %v1347_v41 = vld [vmem:[%s2008_s0 + $0x48] sm:$0xff] }
 0x196   :  { %v1434_v43 = vpop.eup %1433  ;;  %v224_v44 = vmul.f32 1.442695, %v221_v42  ;;  %v1346_v42 = vld [vmem:[%s2008_s0 + $0x40] sm:$0xff] }
 0x197   :  { %v226_v45 = vsel %vm159_vm1, %v1434_v43, 0.0 }
 0x198   :  { %1435 = vpow2.f32 %v224_v44  ;;  %227 = vadd.xlane.f32.xlu1 %v226_v45 }
 0x19e   :  { %v1436_v46 = vpop.eup %1435 }
 0x19f   :  { %v229_v47 = vsel %vm159_vm1, %v1436_v46, 0.0 }
 0x1a0   :  { %230 = vadd.xlane.f32.xlu0 %v229_v47 }
 0x20b   :  { %v228_v56 = vpop.xlane.xlu1 %227 }
 0x20c   :  { %1437 = vrcp.f32 %v228_v56 }
 0x212   :  { %v1438_v57 = vpop.eup %1437 }
 0x213   :  { %v234_v58 = vmul.f32 %v1438_v57, %v1434_v43  ;;  %v231_v59 = vpop.xlane.xlu0 %230 }
 0x214   :  { %1439 = vrcp.f32 %v231_v59 }
 0x215   :  { %1312 = vmatmul.msk.f32.vlgmr.msra.gmra.mxu3 %vm159_vm1, %v234_v58 }
 0x216   :  { %527 = vmatpush.msra.mxu3 %v1341_v49 }
 0x21a   :  { %v1440_v61 = vpop.eup %1439 }
 0x21b   :  { %v235_v63 = vmul.f32 %v1440_v61, %v1436_v46 }
 0x21d   :  { %1313 = vmatmul.msk.f32.vlgmr.msrb.gmra.mxu0 %vm159_vm1, %v235_v63  ;;  %1333 = vmatmul.msk.f32.vlgmr.msrb.gmra.mxu3 %vm67_vm0, %v1619_v7  ;;  %v1362_v63 = vld [vmem:[%s1989_s3 + $0x50] sm:$0xff] }
 0x21e   :  { %1337 = vmatpush.xpose.msk.msrb.mxu0 %vm159_vm1, %v347_v62  ;;  %v1363_v62 = vld [vmem:[%s1989_s3 + $0x58] sm:$0xff] }
 0x21f   :  { %652 = vmatpush.msrb.mxu3 %v1363_v62 }
 0x221   :  { %653 = vmatpush.msrb.mxu3 %v1362_v63 }
 0x223   :  { %654 = vmatpush.msrb.mxu3 %v1361_v1 }
 0x225   :  { %1336 = vmatmul.msk.f32.vlgmr.msra.gmra.mxu0 %vm159_vm1, %v311_v2  ;;  %1334 = vmatmul.msk.f32.gmra.mxu3 %vm67_vm0, %v1631_v9  ;;  %v1360_v2 = vld [vmem:[%s1989_s3 + $0x40] sm:$0xff] }
 0x226   :  { %556 = vmatpush.msra.mxu0 %v282_v5  ;;  %655 = vmatpush.msrb.mxu3 %v1360_v2 }
 0x22d   :  { %1338 = vmatmul.msk.f32.vlgmr.msrb.gmra.mxu0 %vm159_vm1, %v314_v4 }
 0x298   :  { %v256_v10 = vpop.f32.mrf.mxu3 }
 0x299   :  { %1344 = vmatmul.msk.f32.vlgmr.msra.gmra.mxu0 %vm159_vm1, %v256_v10 }
 0x29a   :  { %v279_v11 = vpop.f32.mrf.mxu0 }
 0x2a0   :  { %v376_v31 = vpop.f32.mrf.mxu3 }
 0x2a1   :  { %1345 = vmatmul.msk.f32.gmra.mxu0 %vm159_vm1, %v279_v11  ;;  %v377_v32 = vadd.f32 %v1419_v30, %v376_v31  ;;  %v1378_v31 = vld [vmem:[%s2008_s0 + $0x70] sm:$0xff] }
 0x2a2   :  { %v405_v12 = vpop.f32.mrf.mxu0 }
 0x2a3   :  { %v434_v16 = vmul.f32 0.35355338, %v405_v12  ;;  %476 = vmatpush.msra.mxu1 %v377_v32  ;;  %v1383_v32 = vld [vmem:[%s1988_s2 + $0x60] sm:$0xff] }
 0x2a5   :  { %v436_v17 = vsel %vm159_vm1, %v434_v16, -inf  ;;  %586 = vmatpush.msrb.mxu1 %v1349_v39 }
 0x2a7   :  { %587 = vmatpush.msrb.mxu1 %v1348_v40 }
 0x2a8   :  { %v379_v33 = vpop.f32.mrf.mxu3 }
 0x2a9   :  { %v380_v34 = vadd.f32 %v1419_v30, %v379_v33  ;;  %588 = vmatpush.msrb.mxu1 %v1347_v41  ;;  %v1384_v30 = vld [vmem:[%s1988_s2 + $0x68] sm:$0xff] }
 0x2aa   :  { %v431_v13 = vpop.f32.mrf.mxu0 }
 0x2ab   :  { %v435_v14 = vmul.f32 0.35355338, %v431_v13  ;;  %499 = vmatpush.msra.mxu2 %v380_v34  ;;  %589 = vmatpush.msrb.mxu1 %v1346_v42  ;;  %v1377_v34 = vld [vmem:[%s2008_s0 + $0x68] sm:$0xff] }
 0x2ad   :  { %v439_v15 = vsel %vm159_vm1, %v435_v14, -inf  ;;  %619 = vmatpush.msrb.mxu2 %v1356_v35 }
 0x2ae   :  { %440 = vmax.xlane.f32.xlu2 %v439_v15 }
 0x2af   :  { %620 = vmatpush.msrb.mxu2 %v1355_v36  ;;  %v1376_v36 = vld [vmem:[%s2008_s0 + $0x60] sm:$0xff] }
 0x2b1   :  { %621 = vmatpush.msrb.mxu2 %v1354_v37 }
 0x2b3   :  { %622 = vmatpush.msrb.mxu2 %v1353_v38 }
 0x2b6   :  { %437 = vmax.xlane.f32.xlu2 %v436_v17 }
 0x316   :  { %v1797_v0 = vpop.f32.mrf.mxu0 }
 0x31e   :  { %v1807_v3 = vpop.f32.mrf.mxu0 }
 0x321   :  { %v441_v20 = vpop.xlane.xlu2 %440 }
 0x322   :  { %v443_v21 = vsub.f32 %v435_v14, %v441_v20 }
 0x324   :  { %v446_v22 = vmul.f32 1.442695, %v443_v21 }
 0x326   :  { %1441 = vpow2.f32 %v446_v22 }
 0x329   :  { %v438_v23 = vpop.xlane.xlu2 %437 }
 0x32a   :  { %v442_v24 = vsub.f32 %v434_v16, %v438_v23 }
 0x32c   :  { %v1442_v25 = vpop.eup %1441  ;;  %v444_v26 = vmul.f32 1.442695, %v442_v24  ;;  %v1422_v24 = vld [vmem:[%s1992_s6 + $0x2] ss:$0 sm:$0xff] }
 0x32d   :  { %v451_v27 = vsel %vm159_vm1, %v1442_v25, 0.0 }
 0x32e   :  { %1443 = vpow2.f32 %v444_v26  ;;  %452 = vadd.xlane.f32.xlu0 %v451_v27  ;;  %v1386_v27 = vld [vmem:[%s1988_s2 + $0x78] sm:$0xff] }
 0x334   :  { %v1444_v28 = vpop.eup %1443 }
 0x335   :  { %v448_v29 = vsel %vm159_vm1, %v1444_v28, 0.0 }
 0x336   :  { %449 = vadd.xlane.f32.xlu1 %v448_v29  ;;  %v1379_v29 = vld [vmem:[%s2008_s0 + $0x78] sm:$0xff] }
 0x3a1   :  { %v453_v43 = vpop.xlane.xlu0 %452 }
 0x3a2   :  { %1445 = vrcp.f32 %v453_v43  ;;  %v1373_v43 = vld [vmem:[%s1993_s7 + $0x10] sm:$0xff] }
 0x3a8   :  { %v1446_v44 = vpop.eup %1445 }
 0x3a9   :  { %v457_v45 = vmul.f32 %v1446_v44, %v1442_v25  ;;  %v450_v46 = vpop.xlane.xlu1 %449  ;;  %v1423_v44 = vld [vmem:[%s1991_s5 + $0x3] ss:$0 sm:$0xff] }
 0x3aa   :  { %1447 = vrcp.f32 %v450_v46 }
 0x3ab   :  { %1340 = vmatmul.msk.f32.vlgmr.msra.gmra.mxu2 %vm159_vm1, %v457_v45 }
 0x3b0   :  { %v1448_v47 = vpop.eup %1447 }
 0x3b1   :  { %v456_v48 = vmul.f32 %v1448_v47, %v1444_v28  ;;  %v1385_v28 = vld [vmem:[%s1988_s2 + $0x70] sm:$0xff] }
 0x3b3   :  { %1339 = vmatmul.msk.f32.vlgmr.msra.gmra.mxu1 %vm159_vm1, %v456_v48  ;;  %1358 = vmatmul.msk.f32.vlgmr.msrb.gmra.mxu2 %vm67_vm0, %v1619_v7 }
 0x3bb   :  { %1359 = vmatmul.msk.f32.gmra.mxu2 %vm67_vm0, %v1631_v9  ;;  %1351 = vmatmul.msk.f32.vlgmr.msrb.gmra.mxu1 %vm67_vm0, %v1619_v7 }
 0x3c3   :  { %1352 = vmatmul.msk.f32.gmra.mxu1 %vm67_vm0, %v1631_v9 }
 0x42e   :  { %v501_v50 = vpop.f32.mrf.mxu2 }
 0x430   :  { %v478_v51 = vpop.f32.mrf.mxu1 }
 0x431   :  { %1342 = vmatmul.msk.f32.vlgmr.msra.gmra.mxu3 %vm159_vm1, %v478_v51 }
 0x432   :  { %873 = vmatpush.msra.mxu3 %v1386_v27 }
 0x434   :  { %874 = vmatpush.msra.mxu3 %v1385_v28 }
 0x436   :  { %v624_v54 = vpop.f32.mrf.mxu2  ;;  %875 = vmatpush.msra.mxu3 %v1384_v30 }
 0x437   :  { %v625_v55 = vadd.f32 %v1420_v52, %v624_v54 }
 0x438   :  { %v591_v56 = vpop.f32.mrf.mxu1  ;;  %876 = vmatpush.msra.mxu3 %v1383_v32 }
 0x439   :  { %1343 = vmatmul.msk.f32.gmra.mxu3 %vm159_vm1, %v501_v50  ;;  %v592_v57 = vadd.f32 %v1421_v53, %v591_v56  ;;  %1367 = vmatpush.xpose.msk.msrb.mxu0 %vm159_vm1, %v625_v55  ;;  %v1393_v56 = vld [vmem:[%s1989_s3 + $0x78] sm:$0xff] }
 0x43c   :  { %1368 = vmatmul.msk.f32.vlgmr.msrb.gmra.mxu0 %vm159_vm1, %v592_v57 }
 0x43e   :  { %v627_v58 = vpop.f32.mrf.mxu2 }
 0x43f   :  { %v628_v59 = vadd.f32 %v1420_v52, %v627_v58  ;;  %v1424_v52 = vld [vmem:[%s1990_s4 + $0x3] ss:$0 sm:$0xff] }
 0x440   :  { %v594_v60 = vpop.f32.mrf.mxu1 }
 0x441   :  { %v595_v61 = vadd.f32 %v1421_v53, %v594_v60  ;;  %1369 = vmatpush.xpose.msk.msra.mxu1 %vm159_vm1, %v628_v59  ;;  %1365 = vmatmul.msk.f32.vlgmr.msrb.gmra.mxu3 %vm67_vm0, %v1619_v7 }
 0x444   :  { %1370 = vmatmul.msk.f32.vlgmr.msra.gmra.mxu1 %vm159_vm1, %v595_v61 }
 0x445   :  { %808 = vmatpush.msrb.mxu1 %v1373_v43 }
 0x449   :  { %1366 = vmatmul.msk.f32.gmra.mxu3 %vm67_vm0, %v1631_v9 }
 0x451   :  { %1388 = vmatmul.msk.f32.vlgmr.msra.gmra.mxu3 %vm67_vm0, %v1619_v7 }
 0x459   :  { %1389 = vmatmul.msk.f32.gmra.mxu3 %vm67_vm0, %v1631_v9 }
 0x4b4   :  { %v529_v22 = vpop.f32.mrf.mxu3 }
 0x4b5   :  { %v559_v57 = vadd.f32 %v1797_v0, %v529_v22  ;;  %v1392_v0 = vld [vmem:[%s1989_s3 + $0x70] sm:$0xff] }
 0x4b9   :  { %v686_v4 = vpop.f32.mrf.mxu0 }
 0x4ba   :  { %v715_v5 = vmul.f32 0.35355338, %v686_v4 }
 0x4bc   :  { %v717_v6 = vsel %vm159_vm1, %v715_v5, -inf  ;;  %v1815_v23 = vpop.f32.mrf.mxu3 }
 0x4bd   :  { %718 = vmax.xlane.f32.xlu2 %v717_v6  ;;  %v562_v60 = vadd.f32 %v1807_v3, %v1815_v23  ;;  %v1391_v3 = vld [vmem:[%s1989_s3 + $0x68] sm:$0xff] }
 0x4c1   :  { %v712_v8 = vpop.f32.mrf.mxu1 }
 0x4c2   :  { %v716_v10 = vmul.f32 0.35355338, %v712_v8  ;;  %v1390_v8 = vld [vmem:[%s1989_s3 + $0x60] sm:$0xff] }
 0x4c4   :  { %v720_v11 = vsel %vm159_vm1, %v716_v10, -inf  ;;  %v657_v25 = vpop.f32.mrf.mxu3 }
 0x4c5   :  { %721 = vmax.xlane.f32.xlu0 %v720_v11  ;;  %v658_v26 = vadd.f32 %v1422_v24, %v657_v25 }
 0x4c7   :  { %757 = vmatpush.msra.mxu2 %v658_v26 }
 0x4c9   :  { %840 = vmatpush.msrb.mxu2 %v1379_v29 }
 0x4cb   :  { %841 = vmatpush.msrb.mxu2 %v1378_v31  ;;  %v1403_v31 = vld [vmem:[%s1993_s7 + $0x18] sm:$0xff] }
 0x4cc   :  { %v660_v33 = vpop.f32.mrf.mxu3 }
 0x4cd   :  { %v661_v35 = vadd.f32 %v1422_v24, %v660_v33  ;;  %842 = vmatpush.msrb.mxu2 %v1377_v34  ;;  %v1426_v34 = vld [vmem:[%s1994_s8] ss:$0 sm:$0xff] }
 0x4cf   :  { %780 = vmatpush.msra.mxu0 %v661_v35  ;;  %843 = vmatpush.msrb.mxu2 %v1376_v36 }
 0x4d1   :  { %906 = vmatpush.msrb.mxu0 %v1393_v56 }
 0x4d3   :  { %907 = vmatpush.msrb.mxu0 %v1392_v0  ;;  %v1187_v0 = vld [vmem:[%s1999_s13 + $0x28] sm:$0xff] }
 0x4d4   :  { %v878_v45 = vpop.f32.mrf.mxu3 }
 0x4d5   :  { %v879_v46 = vadd.f32 %v1423_v44, %v878_v45  ;;  %908 = vmatpush.msrb.mxu0 %v1391_v3  ;;  %v1501_v45 = vmov 32.0  }
 0x4d7   :  { %1397 = vmatpush.xpose.msk.msra.mxu1 %vm159_vm1, %v879_v46  ;;  %909 = vmatpush.msrb.mxu0 %v1390_v8 }
 0x4dc   :  { %v881_v47 = vpop.f32.mrf.mxu3 }
 0x4dd   :  { %v882_v48 = vadd.f32 %v1423_v44, %v881_v47 }
 0x530   :  { %v719_v12 = vpop.xlane.xlu2 %718 }
 0x531   :  { %v723_v13 = vsub.f32 %v715_v5, %v719_v12 }
 0x533   :  { %v725_v14 = vmul.f32 1.442695, %v723_v13 }
 0x535   :  { %1449 = vpow2.f32 %v725_v14 }
 0x538   :  { %v722_v15 = vpop.xlane.xlu0 %721 }
 0x539   :  { %v724_v16 = vsub.f32 %v716_v10, %v722_v15 }
 0x53b   :  { %v1450_v17 = vpop.eup %1449  ;;  %v727_v18 = vmul.f32 1.442695, %v724_v16 }
 0x53c   :  { %v729_v19 = vsel %vm159_vm1, %v1450_v17, 0.0 }
 0x53d   :  { %1451 = vpow2.f32 %v727_v18  ;;  %730 = vadd.xlane.f32.xlu1 %v729_v19 }
 0x543   :  { %v1452_v20 = vpop.eup %1451 }
 0x544   :  { %v732_v21 = vsel %vm159_vm1, %v1452_v20, 0.0 }
 0x545   :  { %733 = vadd.xlane.f32.xlu2 %v732_v21 }
 0x5b0   :  { %v731_v37 = vpop.xlane.xlu1 %730 }
 0x5b1   :  { %1453 = vrcp.f32 %v731_v37 }
 0x5b7   :  { %v1454_v38 = vpop.eup %1453 }
 0x5b8   :  { %v737_v39 = vmul.f32 %v1454_v38, %v1450_v17  ;;  %v734_v40 = vpop.xlane.xlu2 %733 }
 0x5b9   :  { %1455 = vrcp.f32 %v734_v40 }
 0x5ba   :  { %1371 = vmatmul.msk.f32.vlgmr.msra.gmra.mxu2 %vm159_vm1, %v737_v39 }
 0x5bb   :  { %1399 = vmatpush.xpose.msk.msra.mxu2 %vm159_vm1, %v882_v48 }
 0x5bf   :  { %v1456_v41 = vpop.eup %1455 }
 0x5c0   :  { %v738_v42 = vmul.f32 %v1456_v41, %v1452_v20  ;;  %v1425_v20 = vld [vmem:[%s1992_s6 + $0x3] ss:$0 sm:$0xff] }
 0x5c2   :  { %1372 = vmatmul.msk.f32.vlgmr.msra.gmra.mxu0 %vm159_vm1, %v738_v42  ;;  %1381 = vmatmul.msk.f32.vlgmr.msrb.gmra.mxu2 %vm67_vm0, %v1619_v7 }
 0x5ca   :  { %1382 = vmatmul.msk.f32.gmra.mxu2 %vm67_vm0, %v1631_v9  ;;  %1395 = vmatmul.msk.f32.vlgmr.msrb.gmra.mxu0 %vm67_vm0, %v1619_v7 }
 0x5d2   :  { %1396 = vmatmul.msk.f32.gmra.mxu0 %vm67_vm0, %v1631_v9 }
 0x63d   :  { %v759_v49 = vpop.f32.mrf.mxu2 }
 0x63e   :  { %1374 = vmatmul.msk.f32.vlgmr.msrb.gmra.mxu1 %vm159_vm1, %v759_v49 }
 0x63f   :  { %v782_v50 = vpop.f32.mrf.mxu0  ;;  %1062 = vmatpush.msrb.mxu1 %v1403_v31 }
 0x645   :  { %v845_v51 = vpop.f32.mrf.mxu2 }
 0x646   :  { %1375 = vmatmul.msk.f32.gmra.mxu1 %vm159_vm1, %v782_v50  ;;  %v846_v53 = vadd.f32 %v1424_v52, %v845_v51 }
 0x647   :  { %v911_v21 = vpop.f32.mrf.mxu0 }
 0x648   :  { %v912_v22 = vadd.f32 %v1425_v20, %v911_v21  ;;  %v1427_v21 = vld [vmem:[%s1995_s9] ss:$0 sm:$0xff] }
 0x64a   :  { %1011 = vmatpush.msra.mxu0 %v912_v22 }
 0x64d   :  { %v848_v54 = vpop.f32.mrf.mxu2 }
 0x64e   :  { %v849_v55 = vadd.f32 %v1424_v52, %v848_v54  ;;  %1398 = vmatmul.msk.f32.vlgmr.msra.gmra.mxu1 %vm159_vm1, %v846_v53 }
 0x64f   :  { %v914_v23 = vpop.f32.mrf.mxu0 }
 0x650   :  { %1400 = vmatmul.msk.f32.vlgmr.msra.gmra.mxu2 %vm159_vm1, %v849_v55  ;;  %v915_v24 = vadd.f32 %v1425_v20, %v914_v23 }
 0x652   :  { %1034 = vmatpush.msrb.mxu0 %v915_v24 }
 0x6bb   :  { %v810_v58 = vpop.f32.mrf.mxu1 }
 0x6bc   :  { %v816_v59 = vadd.f32 %v810_v58, %v559_v57 }
 0x6c3   :  { %v813_v61 = vpop.f32.mrf.mxu1 }
 0x6c4   :  { %v817_v62 = vadd.f32 %v813_v61, %v562_v60  ;;  %v1146_v60 = vld [vmem:[%s1997_s11 + $0x18] sm:$0xff]  ;;  %v1145_v61 = vld [vmem:[%s1997_s11 + $0x10] sm:$0xff] }
 0x6c5   :  { %1169 = vmatpush.msrb.mxu2 %v1146_v60 }
 0x6c7   :  { %1170 = vmatpush.msrb.mxu2 %v1145_v61 }
 0x6cb   :  { %v940_v63 = vpop.f32.mrf.mxu1 }
 0x6cc   :  { %v969_v1 = vmul.f32 0.35355338, %v940_v63  ;;  %v1143_v63 = vld [vmem:[%s1997_s11] sm:$0xff] }
 0x6ce   :  { %v971_v2 = vsel %vm159_vm1, %v969_v1, -inf }
 0x6cf   :  { %972 = vmax.xlane.f32.xlu0 %v971_v2 }
 0x6d3   :  { %v966_v4 = vpop.f32.mrf.mxu2 }
 0x6d4   :  { %v970_v5 = vmul.f32 0.35355338, %v966_v4 }
 0x6d6   :  { %v974_v6 = vsel %vm159_vm1, %v970_v5, -inf }
 0x6d7   :  { %975 = vmax.xlane.f32.xlu1 %v974_v6  ;;  %v1188_v6 = vld [vmem:[%s1999_s13 + $0x30] sm:$0xff] }
 0x742   :  { %v973_v10 = vpop.xlane.xlu0 %972 }
 0x743   :  { %v977_v11 = vsub.f32 %v969_v1, %v973_v10  ;;  %v1186_v10 = vld [vmem:[%s1999_s13 + $0x20] sm:$0xff] }
 0x745   :  { %v979_v12 = vmul.f32 1.442695, %v977_v11 }
 0x747   :  { %1457 = vpow2.f32 %v979_v12 }
 0x74a   :  { %v976_v13 = vpop.xlane.xlu1 %975 }
 0x74b   :  { %v978_v14 = vsub.f32 %v970_v5, %v976_v13  ;;  %v1189_v5 = vld [vmem:[%s1999_s13 + $0x38] sm:$0xff] }
 0x74c   :  { %1209 = vmatpush.msrb.mxu3 %v1189_v5  ;;  %v1185_v13 = vld [vmem:[%s1999_s13 + $0x18] sm:$0xff] }
 0x74d   :  { %v1458_v15 = vpop.eup %1457  ;;  %v981_v16 = vmul.f32 1.442695, %v978_v14 }
 0x74e   :  { %v983_v17 = vsel %vm159_vm1, %v1458_v15, 0.0  ;;  %1210 = vmatpush.msrb.mxu3 %v1188_v6 }
 0x74f   :  { %1459 = vpow2.f32 %v981_v16  ;;  %984 = vadd.xlane.f32.xlu2 %v983_v17 }
 0x750   :  { %1211 = vmatpush.msrb.mxu3 %v1187_v0 }
 0x752   :  { %1212 = vmatpush.msrb.mxu3 %v1186_v10 }
 0x754   :  { %1213 = vmatpush.msrb.mxu3 %v1185_v13 }
 0x755   :  { %v1460_v18 = vpop.eup %1459 }
 0x756   :  { %v986_v19 = vsel %vm159_vm1, %v1460_v18, 0.0 }
 0x757   :  { %987 = vadd.xlane.f32.xlu0 %v986_v19 }
 0x7c2   :  { %v985_v25 = vpop.xlane.xlu2 %984 }
 0x7c3   :  { %1461 = vrcp.f32 %v985_v25  ;;  %v1428_v25 = vld [vmem:[%s1996_s10] ss:$0 sm:$0xff] }
 0x7c9   :  { %v1462_v26 = vpop.eup %1461 }
 0x7ca   :  { %v991_v27 = vmul.f32 %v1462_v26, %v1458_v15  ;;  %v988_v28 = vpop.xlane.xlu0 %987 }
 0x7cb   :  { %1463 = vrcp.f32 %v988_v28 }
 0x7cc   :  { %1401 = vmatmul.msk.f32.vlgmr.msra.gmra.mxu0 %vm159_vm1, %v991_v27  ;;  %1465 = vrcp.f32 %v1501_v45  ;;  %v1430_v45 = vld [vmem:[%s2000_s14] ss:$0 sm:$0xff] }
 0x7d1   :  { %v1464_v29 = vpop.eup %1463 }
 0x7d2   :  { %v992_v30 = vmul.f32 %v1464_v29, %v1460_v18  ;;  %v1466_v46 = vpop.eup %1465 }
 0x7d3   :  { %v1087_v47 = vmul.f32 32.0, %v1466_v46  ;;  %vm1091_vm2 = vweird.f32 %v1466_v46 }
 0x7d4   :  { %1402 = vmatmul.msk.f32.vlgmr.msrb.gmra.mxu0 %vm159_vm1, %v992_v30 }
 0x7d5   :  { %v1088_v48 = vsub.f32 1.0, %v1087_v47 }
 0x7d7   :  { %v1089_v49 = vmul.f32 %v1466_v46, %v1088_v48 }
 0x7d9   :  { %v1090_v50 = vadd.f32 %v1466_v46, %v1089_v49 }
 0x849   :  { %v1013_v32 = vpop.f32.mrf.mxu0 }
 0x84a   :  { %1404 = vmatmul.msk.f32.vlgmr.msrb.gmra.mxu1 %vm159_vm1, %v1013_v32 }
 0x851   :  { %v1036_v33 = vpop.f32.mrf.mxu0 }
 0x852   :  { %1405 = vmatmul.msk.f32.gmra.mxu1 %vm159_vm1, %v1036_v33 }
 0x8c7   :  { %v1064_v35 = vpop.f32.mrf.mxu1 }
 0x8c8   :  { %v1070_v36 = vadd.f32 %v1064_v35, %v816_v59  ;;  %v1184_v35 = vld [vmem:[%s1999_s13 + $0x10] sm:$0xff] }
 0x8c9   :  { %1214 = vmatpush.msrb.mxu3 %v1184_v35 }
 0x8ca   :  { %v1076_v37 = vadd.f32 %v1426_v34, %v1070_v36  ;;  %v1183_v36 = vld [vmem:[%s1999_s13 + $0x8] sm:$0xff] }
 0x8cb   :  { %1215 = vmatpush.msrb.mxu3 %v1183_v36 }
 0x8cc   :  { %v1078_v38 = vadd.f32 %v1076_v37, %v1619_v7  ;;  %v1909_v7 = vsel %vm1091_vm2, %v1466_v46, %v1090_v50  ;;  %v1182_v37 = vld [vmem:[%s1999_s13] sm:$0xff] }
 0x8cd   :  { %1216 = vmatpush.msrb.mxu3 %v1182_v37 }
 0x8ce   :  { %v1080_v39 = vsel %vm67_vm0, %v1078_v38, 0.0 }
 0x8cf   :  { %1081 = vadd.xlane.f32.xlu1 %v1080_v39  ;;  %v1067_v40 = vpop.f32.mrf.mxu1 }
 0x8d0   :  { %v1071_v41 = vadd.f32 %v1067_v40, %v817_v62  ;;  %v1144_v62 = vld [vmem:[%s1997_s11 + $0x8] sm:$0xff] }
 0x8d1   :  { %1171 = vmatpush.msrb.mxu2 %v1144_v62 }
 0x8d2   :  { %v1077_v42 = vadd.f32 %v1426_v34, %v1071_v41 }
 0x8d3   :  { %1172 = vmatpush.msrb.mxu2 %v1143_v63 }
 0x8d4   :  { %v1079_v43 = vadd.f32 %v1077_v42, %v1631_v9 }
 0x8d6   :  { %v1083_v44 = vsel %vm67_vm0, %v1079_v43, 0.0 }
 0x8d7   :  { %1084 = vadd.xlane.f32.xlu2 %v1083_v44 }
 0x942   :  { %v1082_v51 = vpop.xlane.xlu1 %1081 }
 0x943   :  { %v1093_v52 = vmul.f32 %v1909_v7, %v1082_v51 }
 0x945   :  { %v1095_v53 = vsub.f32 %v1078_v38, %v1093_v52  ;;  %v1429_v38 = vld [vmem:[%s1998_s12] ss:$0 sm:$0xff] }
 0x947   :  { %v1097_v54 = vmul.f32 %v1095_v53, %v1095_v53 }
 0x949   :  { %v1099_v9 = vsel %vm67_vm0, %v1097_v54, 0.0 }
 0x94a   :  { %1100 = vadd.xlane.f32.xlu0 %v1099_v9  ;;  %v1085_v55 = vpop.xlane.xlu2 %1084 }
 0x94b   :  { %v1094_v56 = vmul.f32 %v1909_v7, %v1085_v55 }
 0x94d   :  { %v1096_v57 = vsub.f32 %v1079_v43, %v1094_v56 }
 0x94f   :  { %v1098_v58 = vmul.f32 %v1096_v57, %v1096_v57 }
 0x951   :  { %v1102_v59 = vsel %vm67_vm0, %v1098_v58, 0.0 }
 0x952   :  { %1103 = vadd.xlane.f32.xlu1 %v1102_v59 }
 0x9bd   :  { %v1101_v1 = vpop.xlane.xlu0 %1100 }
 0x9be   :  { %v1105_v2 = vmul.f32 %v1101_v1, %v1909_v7 }
 0x9c0   :  { %v1107_v4 = vadd.f32 1e-05, %v1105_v2 }
 0x9c2   :  { %1467 = vrsqrt.f32 %v1107_v4  ;;  %vm1115_vm4 = vweird.f32 %v1107_v4 }
 0x9c5   :  { %v1104_v3 = vpop.xlane.xlu1 %1103 }
 0x9c6   :  { %v1106_v8 = vmul.f32 %v1104_v3, %v1909_v7 }
 0x9c8   :  { %v1468_v11 = vpop.eup %1467  ;;  %v1108_v12 = vadd.f32 1e-05, %v1106_v8 }
 0x9c9   :  { %v1110_v14 = vmul.f32 %v1468_v11, %v1107_v4  ;;  %vm1116_vm3 = vweird.f32 %v1468_v11 }
 0x9ca   :  { %1469 = vrsqrt.f32 %v1108_v12  ;;  %vm1117_vm5 = vmor %vm1115_vm4, %vm1116_vm3  ;;  %vm1125_vm7 = vweird.f32 %v1108_v12 }
 0x9cb   :  { %v1111_v15 = vmul.f32 %v1468_v11, %v1110_v14 }
 0x9cd   :  { %v1112_v16 = vmul.f32 0.5, %v1111_v15  ;;  %v1431_v15 = vld [vmem:[%s2001_s15] ss:$0 sm:$0xff]  ;;  %s1502_s15 = smov [#allocation2]  }
 0x9ce   :  { %s1288_s5 = sshll.u32 %s1502_s15, 4  ;;  %s1289_s5 = int_to_ptr.vmem [resolvable:$true] %s1288_s5 }
 0x9cf   :  { %v1113_v17 = vsub.f32 1.5, %v1112_v16 }
 0x9d0   :  { %v1470_v18 = vpop.eup %1469 }
 0x9d1   :  { %v1114_v19 = vmul.f32 %v1468_v11, %v1113_v17  ;;  %v1120_v20 = vmul.f32 %v1470_v18, %v1108_v12  ;;  %vm1126_vm6 = vweird.f32 %v1470_v18 }
 0x9d2   :  { %vm1127_vm8 = vmor %vm1125_vm7, %vm1126_vm6 }
 0x9d3   :  { %v1118_v22 = vsel %vm1117_vm5, %v1468_v11, %v1114_v19  ;;  %v1121_v23 = vmul.f32 %v1470_v18, %v1120_v20 }
 0x9d4   :  { %v1129_v24 = vmul.f32 %v1118_v22, %v1095_v53 }
 0x9d5   :  { %v1122_v26 = vmul.f32 0.5, %v1121_v23 }
 0x9d6   :  { %v1135_v27 = vmul.f32 %v1427_v21, %v1129_v24 }
 0x9d7   :  { %v1123_v28 = vsub.f32 1.5, %v1122_v26 }
 0x9d8   :  { %v1141_v29 = vadd.f32 %v1428_v25, %v1135_v27 }
 0x9d9   :  { %v1124_v30 = vmul.f32 %v1470_v18, %v1123_v28 }
 0x9da   :  { %1406 = vmatmul.msk.f32.vlgmr.msrb.gmra.mxu2 %vm67_vm0, %v1141_v29 }
 0x9db   :  { %v1128_v31 = vsel %vm1127_vm8, %v1470_v18, %v1124_v30  ;;  %v1432_v18 = vld [vmem:[%s2002_s16] ss:$0 sm:$0xff]  ;;  %s1503_s16 = smov 128  }
 0x9dc   :  { %v1130_v32 = vmul.f32 %v1128_v31, %v1096_v57 }
 0x9de   :  { %v1136_v33 = vmul.f32 %v1427_v21, %v1130_v32 }
 0x9e0   :  { %v1142_v34 = vadd.f32 %v1428_v25, %v1136_v33 }
 0x9e2   :  { %1407 = vmatmul.msk.f32.gmra.mxu2 %vm67_vm0, %v1142_v34 }
 0xa5d   :  { %v1174_v39 = vpop.f32.mrf.mxu2 }
 0xa5e   :  { %v1175_v40 = vadd.f32 %v1429_v38, %v1174_v39 }
 0xa60   :  { %v1180_v41 = vmax.f32 %v1175_v40, 0.0 }
 0xa62   :  { %1408 = vmatmul.msk.f32.vlgmr.msrb.gmra.mxu3 %vm1194_vm9, %v1180_v41 }
 0xa65   :  { %v1177_v42 = vpop.f32.mrf.mxu2 }
 0xa66   :  { %v1178_v43 = vadd.f32 %v1429_v38, %v1177_v42 }
 0xa68   :  { %v1181_v44 = vmax.f32 %v1178_v43, 0.0 }
 0xa6a   :  { %1409 = vmatmul.msk.f32.gmra.mxu3 %vm1194_vm9, %v1181_v44 }
 0xae5   :  { %v1218_v46 = vpop.f32.mrf.mxu3 }
 0xae6   :  { %v1219_v47 = vadd.f32 %v1430_v45, %v1218_v46 }
 0xae8   :  { %v1224_v48 = vadd.f32 %v1219_v47, %v1141_v29 }
 0xaea   :  { %v1226_v49 = vsel %vm67_vm0, %v1224_v48, 0.0 }
 0xaeb   :  { %1227 = vadd.xlane.f32.xlu2 %v1226_v49 }
 0xaed   :  { %v1221_v50 = vpop.f32.mrf.mxu3 }
 0xaee   :  { %v1222_v51 = vadd.f32 %v1430_v45, %v1221_v50 }
 0xaf0   :  { %v1225_v52 = vadd.f32 %v1222_v51, %v1142_v34 }
 0xaf2   :  { %v1229_v53 = vsel %vm67_vm0, %v1225_v52, 0.0 }
 0xaf3   :  { %1230 = vadd.xlane.f32.xlu0 %v1229_v53 }
 0xb5e   :  { %v1228_v54 = vpop.xlane.xlu2 %1227 }
 0xb5f   :  { %v1232_v9 = vmul.f32 %v1228_v54, %v1909_v7 }
 0xb61   :  { %v1234_v55 = vsub.f32 %v1224_v48, %v1232_v9 }
 0xb63   :  { %v1236_v56 = vmul.f32 %v1234_v55, %v1234_v55 }
 0xb65   :  { %v1238_v57 = vsel %vm67_vm0, %v1236_v56, 0.0 }
 0xb66   :  { %v1231_v58 = vpop.xlane.xlu0 %1230  ;;  %1239 = vadd.xlane.f32.xlu1 %v1238_v57 }
 0xb67   :  { %v1233_v59 = vmul.f32 %v1231_v58, %v1909_v7 }
 0xb69   :  { %v1235_v60 = vsub.f32 %v1225_v52, %v1233_v59 }
 0xb6b   :  { %v1237_v61 = vmul.f32 %v1235_v60, %v1235_v60 }
 0xb6d   :  { %v1241_v62 = vsel %vm67_vm0, %v1237_v61, 0.0 }
 0xb6e   :  { %1242 = vadd.xlane.f32.xlu2 %v1241_v62 }
 0xbd9   :  { %v1240_v63 = vpop.xlane.xlu1 %1239 }
 0xbda   :  { %v1244_v1 = vmul.f32 %v1240_v63, %v1909_v7 }
 0xbdc   :  { %v1246_v2 = vadd.f32 1e-05, %v1244_v1 }
 0xbde   :  { %1471 = vrsqrt.f32 %v1246_v2  ;;  %vm1254_vm11 = vweird.f32 %v1246_v2 }
 0xbe1   :  { %v1243_v4 = vpop.xlane.xlu2 %1242 }
 0xbe2   :  { %v1245_v5 = vmul.f32 %v1243_v4, %v1909_v7 }
 0xbe4   :  { %v1472_v6 = vpop.eup %1471  ;;  %v1247_v0 = vadd.f32 1e-05, %v1245_v5 }
 0xbe5   :  { %v1249_v3 = vmul.f32 %v1472_v6, %v1246_v2  ;;  %vm1255_vm10 = vweird.f32 %v1472_v6 }
 0xbe6   :  { %1473 = vrsqrt.f32 %v1247_v0  ;;  %vm1256_vm12 = vmor %vm1254_vm11, %vm1255_vm10  ;;  %vm1264_vm14 = vweird.f32 %v1247_v0 }
 0xbe7   :  { %v1250_v8 = vmul.f32 %v1472_v6, %v1249_v3 }
 0xbe9   :  { %v1251_v10 = vmul.f32 0.5, %v1250_v8 }
 0xbeb   :  { %v1252_v11 = vsub.f32 1.5, %v1251_v10 }
 0xbec   :  { %v1474_v12 = vpop.eup %1473 }
 0xbed   :  { %v1253_v13 = vmul.f32 %v1472_v6, %v1252_v11  ;;  %v1259_v14 = vmul.f32 %v1474_v12, %v1247_v0  ;;  %vm1265_vm13 = vweird.f32 %v1474_v12 }
 0xbee   :  { %vm1266_vm15 = vmor %vm1264_vm14, %vm1265_vm13 }
 0xbef   :  { %v1257_v16 = vsel %vm1256_vm12, %v1472_v6, %v1253_v13  ;;  %v1260_v17 = vmul.f32 %v1474_v12, %v1259_v14 }
 0xbf0   :  { %v1268_v7 = vmul.f32 %v1257_v16, %v1234_v55 }
 0xbf1   :  { %v1261_v19 = vmul.f32 0.5, %v1260_v17 }
 0xbf2   :  { %v1274_v20 = vmul.f32 %v1431_v15, %v1268_v7 }
 0xbf3   :  { %v1262_v21 = vsub.f32 1.5, %v1261_v19 }
 0xbf4   :  { %v1280_v22 = vadd.f32 %v1432_v18, %v1274_v20 }
 0xbf5   :  { %v1263_v23 = vmul.f32 %v1474_v12, %v1262_v21 }
 0xbf6   :  { %1282 = vst.msk [vmem:[#allocation2] sm:$0xff] %vm67_vm0, %v1280_v22 }
 0xbf7   :  { %v1267_v24 = vsel %vm1266_vm15, %v1474_v12, %v1263_v23 }
 0xbf8   :  { %v1269_v25 = vmul.f32 %v1267_v24, %v1235_v60 }
 0xbfa   :  { %v1275_v26 = vmul.f32 %v1431_v15, %v1269_v25 }
 0xbfc   :  { %v1281_v27 = vadd.f32 %v1432_v18, %v1275_v26 }
 0xbfe   :  { %1283 = vst.msk [vmem:[#allocation2 + $0x8] sm:$0xff] %vm67_vm0, %v1281_v27 }
 0xbff   :  { %1296 = dma.vmem_to_hbm [thread:$0]  %s1289_s5, 256, %s1291_s19, [#allocation3], %s1503_s16, %s1503_s16, %s1504_s1  }
 0xc00   :  { %1499 = dma.done.wait [#allocation3], 256  }
 0xc01   :  { %1500 = vsyncadd [#allocation3], 4294967040 }
 0xc02   :  { %1301 = vsyncpa [#allocation3], 1 }

</bundles_post_ra>
